<compile_context>
chip_gen: v7x
topology: tpu7x:2x2x1
jax: 0.10.0
libtpu: 0.0.40
codegen_flags: <defaults>
</compile_context>

<pallas_src>
import functools

import jax
import jax.numpy as jnp
from jax.experimental import pallas as pl
from jax.experimental.pallas import tpu as pltpu


def _round_up(x, m):
    return (x + m - 1) // m * m


# ------------- fused conv1 + pool1 + conv2(stride 2) + pool2 kernel ---------- #

def _conv_tower_kernel(x0_ref, x1_ref, x2_ref, x3_ref, w1_ref, b1_ref,
                       w2_ref, b2_ref, o_ref, c1_ref, p1_ref, im2_ref, c2_ref,
                       *, KW, C2, Wo1, Wp1, Wc2, Wp2):
    """One (batch, final-H-row) step of the conv tower (all channels-last).

    x*_ref : (W, 1)       raw input rows 2*h, 2*h+1, 2*h+2, 2*h+3 (C_in = 1)
    w1_ref : (KW, OC)     conv1 weights        b1_ref : (1, OC)
    w2_ref : (KW*C2, OC)  conv2 weights        b2_ref : (1, OC)
    o_ref  : (Wp2, OC)    pooled features for this final H row
    scratch: c1_ref (Wo1, OC), p1_ref (Wp1, OC),
             im2_ref (Wc2, KW*C2), c2_ref (Wc2, OC)
    """
    w1 = w1_ref[...]                                          # (KW, OC)

    # conv1 (C_in = 1) as KW shifted broadcast MACs on the VPU, fused with the
    # H-window (4 rows) of pool1:  max_j relu(z_j + b) == relu(max_j z_j + b).
    zmax = None
    for x_ref in (x0_ref, x1_ref, x2_ref, x3_ref):
        col = x_ref[...]                                      # (W, 1)
        z = col[0:Wo1, :] * w1[0:1, :]                        # (Wo1, OC)
        for kw in range(1, KW):
            z = z + col[kw:kw + Wo1, :] * w1[kw:kw + 1, :]
        zmax = z if zmax is None else jnp.maximum(zmax, z)
    c1_ref[...] = jnp.maximum(zmax + b1_ref[...], 0.0)        # conv1 + ReLU + pool1-H

    # pool1 along W: window 3, stride 3 (strided VMEM reads, no HBM traffic).
    p1 = jnp.maximum(
        jnp.maximum(c1_ref[pl.ds(0, Wp1, 3), :],
                    c1_ref[pl.ds(1, Wp1, 3), :]),
        c1_ref[pl.ds(2, Wp1, 3), :])
    p1_ref[...] = p1                                          # (Wp1, OC)

    # conv2, stride 2 along W: in-kernel even/odd phase split, im2col assembled
    # in VMEM with K = KW*C2 = 224, and a single MXU dot.
    p1e = p1_ref[pl.ds(0, Wc2 + 3, 2), :]                     # p1[2m]
    p1o = p1_ref[pl.ds(1, Wc2 + 2, 2), :]                     # p1[2m+1]
    for kw in range(KW):
        src = p1e if kw % 2 == 0 else p1o                     # -> p1[2*w2 + kw]
        a = kw // 2
        im2_ref[:, kw * C2:(kw + 1) * C2] = src[a:a + Wc2, :]
    c2 = jnp.dot(im2_ref[...], w2_ref[...],
                 preferred_element_type=jnp.float32) + b2_ref[...]
    c2_ref[...] = jnp.maximum(c2, 0.0)                        # conv2 + ReLU (Wc2, OC)

    # pool2 along W: window 3, stride 3.
    p2 = jnp.maximum(
        jnp.maximum(c2_ref[pl.ds(0, Wp2, 3), :],
                    c2_ref[pl.ds(1, Wp2, 3), :]),
        c2_ref[pl.ds(2, Wp2, 3), :])
    o_ref[...] = p2.astype(o_ref.dtype)


def conv_tower(x_nchw, w1_t, b1, w2_t, b2):
    """Fused conv1+ReLU+pool1(4,3)/(1,3)+conv2(s2)+ReLU+pool2(1,3)/(1,3).

    x_nchw: (N, 1, H, W); conv weights in PyTorch layout (OC, IC, 1, KW).
    Returns NHWC pooled features (N, Hc2, Wp2, 32).
    """
    N, C, H, W = x_nchw.shape
    assert C == 1
    OC1, IC1, KH1, KW = w1_t.shape
    OC2, C2, KH2, KW2 = w2_t.shape
    assert IC1 == 1 and KH1 == 1 and KH2 == 1 and KW2 == KW and C2 == OC1

    Wo1 = W - KW + 1                      # conv1, stride 1
    Hp1 = H - 4 + 1                       # pool1 H: window 4, stride 1
    Wp1 = (Wo1 - 3) // 3 + 1              # pool1 W: window 3, stride 3
    Hc2 = (Hp1 - 1) // 2 + 1              # conv2, stride 2 in H (KH = 1)
    Wc2 = (Wp1 - KW) // 2 + 1             # conv2, stride 2 in W
    Wp2 = (Wc2 - 3) // 3 + 1              # pool2 W: window 3, stride 3
    assert Hp1 >= 1 and Wc2 >= 1 and Wp2 >= 1

    x = jnp.reshape(x_nchw, (N, H, W, 1))                     # free (C = 1)
    w1m = jnp.transpose(w1_t[:, 0, 0, :], (1, 0)).astype(jnp.float32)       # (KW, OC)
    w2m = jnp.transpose(w2_t[:, :, 0, :], (2, 1, 0)).reshape(KW * C2, OC2)  # (KW*C, OC)
    w2m = w2m.astype(jnp.float32)
    b1m = b1.reshape(1, OC1).astype(jnp.float32)
    b2m = b2.reshape(1, OC2).astype(jnp.float32)

    kern = functools.partial(_conv_tower_kernel, KW=KW, C2=C2, Wo1=Wo1,
                             Wp1=Wp1, Wc2=Wc2, Wp2=Wp2)
    # Final H row h reads raw input rows 2*h .. 2*h+3 (pool1 H-window through
    # conv2's H stride of 2); the raw C=1 input is tiny so the 2x row overlap
    # across steps is negligible.
    in_specs = (
        [pl.BlockSpec((None, None, W, 1), (lambda n, h, j=j: (n, 2 * h + j, 0, 0)))
         for j in range(4)]
        + [pl.BlockSpec((KW, OC1), lambda n, h: (0, 0)),
           pl.BlockSpec((1, OC1), lambda n, h: (0, 0)),
           pl.BlockSpec((KW * C2, OC2), lambda n, h: (0, 0)),
           pl.BlockSpec((1, OC2), lambda n, h: (0, 0))])
    return pl.pallas_call(
        kern,
        grid=(N, Hc2),
        in_specs=in_specs,
        out_specs=pl.BlockSpec((None, None, Wp2, OC2), lambda n, h: (n, h, 0, 0)),
        out_shape=jax.ShapeDtypeStruct((N, Hc2, Wp2, OC2), jnp.float32),
        scratch_shapes=[pltpu.VMEM((Wo1, OC1), jnp.float32),
                        pltpu.VMEM((Wp1, OC1), jnp.float32),
                        pltpu.VMEM((Wc2, KW * C2), jnp.float32),
                        pltpu.VMEM((Wc2, OC2), jnp.float32)],
        compiler_params=pltpu.CompilerParams(
            dimension_semantics=("parallel", "parallel")),
    )(x, x, x, x, w1m, b1m, w2m, b2m)


# ----------------- fused dense head (K-tiled, bf16 weights) ----------------- #

def _fused_dense_kernel(feat_ref, w1_ref, b1_ref, w2_ref, b2_ref,
                        w3_ref, b3_ref, o_ref, acc_ref):
    k = pl.program_id(0)

    @pl.when(k == 0)
    def _init():
        acc_ref[...] = jnp.zeros_like(acc_ref)

    # K-tiled dense_1: bf16 tiles streamed by BlockSpec, f32 accumulation.
    acc_ref[...] += jnp.dot(feat_ref[...], w1_ref[...],
                            preferred_element_type=jnp.float32)

    @pl.when(k == pl.num_programs(0) - 1)
    def _finalize():
        h1 = jnp.maximum(acc_ref[...] + b1_ref[...], 0.0)          # dense_1 + ReLU
        h2 = jnp.dot(h1.astype(w2_ref.dtype), w2_ref[...],
                     preferred_element_type=jnp.float32) + b2_ref[...]
        h2 = jnp.maximum(h2, 0.0)                                  # dense_2 + ReLU
        # TODO(synk): Dropout(0.5) is identity at inference; training RNG masking not implemented.
        out = jnp.dot(h2.astype(w3_ref.dtype), w3_ref[...],
                      preferred_element_type=jnp.float32) + b3_ref[...]
        o_ref[...] = out.astype(o_ref.dtype)                       # dense_3 (lane-dense)


def _dense_tiling(K, tk_max=8192):
    tk = min(tk_max, _round_up(K, 128))
    Kp = _round_up(K, tk)
    return tk, Kp


def _dense_vmem_limit(M, tk, H1, Np):
    """VMEM limit from the actual per-step working set (+ generous headroom)."""
    bf16, f32 = 2, 4
    db = 2                                                # double-buffered blocks
    need = db * (M * tk * bf16 + tk * H1 * bf16)          # feat / w1 K tiles
    need += db * (H1 * H1 * bf16 + H1 * Np * bf16)        # resident w2 / w3
    need += db * (2 * H1 * f32 + Np * f32)                # biases
    need += db * (M * Np * f32)                           # output block
    need += M * H1 * f32                                  # accumulator scratch
    return min(max(2 * need, 16 * 1024 * 1024), 64 * 1024 * 1024)


def fused_dense_head(feat, w1, b1, w2, b2, w3, b3, *, tk):
    """relu(feat@w1+b1) -> relu(@w2+b2) -> @w3+b3 in a single pallas_call.

    feat:(M,Kp) bf16 zero-padded; w1:(Kp,H1) bf16; w2:(H1,H1) bf16;
    w3:(H1,Np) bf16 zero-padded to lane-dense Np; biases f32 (1,·).
    """
    M, Kp = feat.shape
    H1 = w1.shape[1]
    Np = w3.shape[1]
    assert Kp % tk == 0 and w1.shape[0] == Kp
    nk = Kp // tk
    return pl.pallas_call(
        _fused_dense_kernel,
        grid=(nk,),
        in_specs=[
            pl.BlockSpec((M, tk), lambda k: (0, k)),
            pl.BlockSpec((tk, H1), lambda k: (k, 0)),
            pl.BlockSpec((1, H1), lambda k: (0, 0)),
            pl.BlockSpec((H1, H1), lambda k: (0, 0)),
            pl.BlockSpec((1, H1), lambda k: (0, 0)),
            pl.BlockSpec((H1, Np), lambda k: (0, 0)),
            pl.BlockSpec((1, Np), lambda k: (0, 0)),
        ],
        out_specs=pl.BlockSpec((M, Np), lambda k: (0, 0)),
        out_shape=jax.ShapeDtypeStruct((M, Np), jnp.float32),
        scratch_shapes=[pltpu.VMEM((M, H1), jnp.float32)],
        compiler_params=pltpu.CompilerParams(
            dimension_semantics=("arbitrary",),
            vmem_limit_bytes=_dense_vmem_limit(M, tk, H1, Np)),
    )(feat, w1, b1, w2, b2, w3, b3)


# ------------------------------- forward pass ------------------------------- #

def cnn_forward(params, dense, x_nchw):
    feat_nhwc = conv_tower(x_nchw, params["w1"], params["b1"],
                           params["w2"], params["b2"])
    N = feat_nhwc.shape[0]
    feat = feat_nhwc.reshape(N, -1)   # == torch permute(0,2,3,1).contiguous().view(-1, F)
    K = feat.shape[1]
    tk, Kp = _dense_tiling(K)
    featp = jnp.pad(feat.astype(jnp.bfloat16), ((0, 0), (0, Kp - K)))
    out = fused_dense_head(featp, dense["w1"], dense["b1"], dense["w2"],
                           dense["b2"], dense["w3"], dense["b3"], tk=tk)
    n_out = params["wd3"].shape[0]
    return out[:, :n_out]


def init_params(key, feat_dim):
    """Parameters in PyTorch layouts (Conv2d: (out,in,1,7); Linear: (out,in))."""
    ks = jax.random.split(key, 10)
    f32 = jnp.float32
    return {
        "w1": 0.10 * jax.random.normal(ks[0], (32, 1, 1, 7), f32),
        "b1": 0.01 * jax.random.normal(ks[1], (32,), f32),
        "w2": 0.10 * jax.random.normal(ks[2], (32, 32, 1, 7), f32),
        "b2": 0.01 * jax.random.normal(ks[3], (32,), f32),
        "wd1": 0.05 * jax.random.normal(ks[4], (128, feat_dim), f32),
        "bd1": 0.01 * jax.random.normal(ks[5], (128,), f32),
        "wd2": 0.05 * jax.random.normal(ks[6], (128, 128), f32),
        "bd2": 0.01 * jax.random.normal(ks[7], (128,), f32),
        "wd3": 0.05 * jax.random.normal(ks[8], (1, 128), f32),
        "bd3": 0.01 * jax.random.normal(ks[9], (1,), f32),
    }


def prepare_dense_params(params):
    """One-time inference-layout prep for the dense head: pre-transposed
    (in,out) bf16 weights, K padded to the K-tile multiple, and the 1-wide
    dense_3 padded to lane-dense 128 output columns (sliced back after)."""
    wd1, wd2, wd3 = params["wd1"], params["wd2"], params["wd3"]
    H1, K = wd1.shape                                          # torch Linear: (out, in)
    n_out = wd3.shape[0]
    _, Kp = _dense_tiling(K)
    Np = 128                                                   # lane-dense final head
    w1 = jnp.zeros((Kp, H1), jnp.bfloat16).at[:K, :].set(wd1.T.astype(jnp.bfloat16))
    w2 = wd2.T.astype(jnp.bfloat16)
    w3 = jnp.zeros((H1, Np), jnp.bfloat16).at[:, :n_out].set(wd3.T.astype(jnp.bfloat16))
    b1 = params["bd1"].reshape(1, H1).astype(jnp.float32)
    b2 = params["bd2"].reshape(1, H1).astype(jnp.float32)
    b3 = jnp.zeros((1, Np), jnp.float32).at[:, :n_out].set(
        params["bd3"].reshape(1, n_out).astype(jnp.float32))
    return {"w1": w1, "b1": b1, "w2": w2, "b2": b2, "w3": w3, "b3": b3}


if __name__ == "__main__":
    key = jax.random.PRNGKey(0)
    kx, kp = jax.random.split(key)

    # Small-scale input consistent with the module (NCHW like PyTorch):
    # conv1 -> (2,32,5,58); pool1 -> (2,32,2,19); conv2 -> (2,32,1,7);
    # pool2 -> (2,32,1,2); flatten (NHWC order) -> (2, 64) [87360 in the full model].
    x = jax.random.normal(kx, (2, 1, 5, 64), jnp.float32)
    params = init_params(kp, feat_dim=1 * 2 * 32)
    dense = prepare_dense_params(params)

    fwd = jax.jit(cnn_forward)
    out = jax.block_until_ready(fwd(params, dense, x))
    assert out.shape == (2, 1) and out.dtype == jnp.float32
    print("KERNEL_OK")
</pallas_src>

<mosaic_0001>
module attributes {stable_mosaic.version = 11 : i64} {
  func.func @_fused_dense_kernel(%arg0: i32, %arg1: memref<2x128xbf16, #tpu.memory_space<vmem>>, %arg2: memref<128x128xbf16, #tpu.memory_space<vmem>>, %arg3: memref<1x128xf32, #tpu.memory_space<vmem>>, %arg4: memref<128x128xbf16, #tpu.memory_space<vmem>>, %arg5: memref<1x128xf32, #tpu.memory_space<vmem>>, %arg6: memref<128x128xbf16, #tpu.memory_space<vmem>>, %arg7: memref<1x128xf32, #tpu.memory_space<vmem>>, %arg8: memref<2x128xf32, #tpu.memory_space<vmem>>, %arg9: memref<2x128xf32, #tpu.memory_space<vmem>>) attributes {dimension_semantics = [#tpu.dimension_semantics<arbitrary>], iteration_bounds = array<i64: 1>, scalar_prefetch = 0 : i64, scratch_operands = 1 : i64, tpu.core_type = #tpu.core_type<tc>, window_params = [{transform_indices = @transform_0, window_bounds = array<i64: 2, 128>}, {transform_indices = @transform_1, window_bounds = array<i64: 128, 128>}, {pipeline_mode = #tpu.pipeline_mode<synchronous>, transform_indices = @transform_2, window_bounds = array<i64: 1, 128>}, {pipeline_mode = #tpu.pipeline_mode<synchronous>, transform_indices = @transform_3, window_bounds = array<i64: 128, 128>}, {pipeline_mode = #tpu.pipeline_mode<synchronous>, transform_indices = @transform_4, window_bounds = array<i64: 1, 128>}, {pipeline_mode = #tpu.pipeline_mode<synchronous>, transform_indices = @transform_5, window_bounds = array<i64: 128, 128>}, {pipeline_mode = #tpu.pipeline_mode<synchronous>, transform_indices = @transform_6, window_bounds = array<i64: 1, 128>}, {pipeline_mode = #tpu.pipeline_mode<synchronous>, transform_indices = @transform_7, window_bounds = array<i64: 2, 128>}]} {
    %c0_i32 = arith.constant 0 : i32
    %0 = arith.cmpi eq, %arg0, %c0_i32 : i32
    %1 = arith.extui %0 : i1 to i32
    %c0_i32_0 = arith.constant 0 : i32
    %2 = arith.cmpi ne, %1, %c0_i32_0 : i32
    scf.if %2 {
      %cst_10 = arith.constant 0.000000e+00 : f32
      %12 = vector.broadcast %cst_10 : f32 to vector<2x128xf32>
      %c0_11 = arith.constant 0 : index
      %c0_12 = arith.constant 0 : index
      %13 = vector.load %arg9[%c0_11, %c0_12] : memref<2x128xf32, #tpu.memory_space<vmem>>, vector<2x128xf32>
      tpu.vector_store %arg9[%c0_11, %c0_12], %12 {strides = array<i32>} : memref<2x128xf32, #tpu.memory_space<vmem>>, vector<2x128xf32>,
    } else {
    }
    %c0 = arith.constant 0 : index
    %c0_1 = arith.constant 0 : index
    %3 = vector.load %arg9[%c0, %c0_1] : memref<2x128xf32, #tpu.memory_space<vmem>>, vector<2x128xf32>
    %c0_2 = arith.constant 0 : index
    %c0_3 = arith.constant 0 : index
    %4 = vector.load %arg1[%c0_2, %c0_3] : memref<2x128xbf16, #tpu.memory_space<vmem>>, vector<2x128xbf16>
    %c0_4 = arith.constant 0 : index
    %c0_5 = arith.constant 0 : index
    %5 = vector.load %arg2[%c0_4, %c0_5] : memref<128x128xbf16, #tpu.memory_space<vmem>>, vector<128x128xbf16>
    %cst = arith.constant dense<0.000000e+00> : vector<2x128xf32>
    %6 = tpu.matmul %4, %5, %cst {dimension_numbers = #tpu.dot_dimension_numbers<[1], [0], [0], [1], [0, 0, 1, 1], [], []>} : vector<2x128xbf16>, vector<128x128xbf16>, vector<2x128xf32> -> vector<2x128xf32>
    %7 = arith.addf %3, %6 : vector<2x128xf32>
    %c0_6 = arith.constant 0 : index
    %c0_7 = arith.constant 0 : index
    %8 = vector.load %arg9[%c0_6, %c0_7] : memref<2x128xf32, #tpu.memory_space<vmem>>, vector<2x128xf32>
    tpu.vector_store %arg9[%c0_6, %c0_7], %7 {strides = array<i32>} : memref<2x128xf32, #tpu.memory_space<vmem>>, vector<2x128xf32>,
    %c0_i32_8 = arith.constant 0 : i32
    %9 = arith.cmpi eq, %arg0, %c0_i32_8 : i32
    %10 = arith.extui %9 : i1 to i32
    %c0_i32_9 = arith.constant 0 : i32
    %11 = arith.cmpi ne, %10, %c0_i32_9 : i32
    scf.if %11 {
      %c0_10 = arith.constant 0 : index
      %c0_11 = arith.constant 0 : index
      %12 = vector.load %arg9[%c0_10, %c0_11] : memref<2x128xf32, #tpu.memory_space<vmem>>, vector<2x128xf32>
      %c0_12 = arith.constant 0 : index
      %c0_13 = arith.constant 0 : index
      %13 = vector.load %arg3[%c0_12, %c0_13] : memref<1x128xf32, #tpu.memory_space<vmem>>, vector<1x128xf32>
      %14 = vector.broadcast %13 : vector<1x128xf32> to vector<2x128xf32>
      %15 = arith.addf %12, %14 : vector<2x128xf32>
      %cst_14 = arith.constant 0.000000e+00 : f32
      %16 = vector.broadcast %cst_14 : f32 to vector<2x128xf32>
      %17 = arith.maximumf %15, %16 : vector<2x128xf32>
      %18 = arith.truncf %17 : vector<2x128xf32> to vector<2x128xbf16>
      %c0_15 = arith.constant 0 : index
      %c0_16 = arith.constant 0 : index
      %19 = vector.load %arg4[%c0_15, %c0_16] : memref<128x128xbf16, #tpu.memory_space<vmem>>, vector<128x128xbf16>
      %cst_17 = arith.constant dense<0.000000e+00> : vector<2x128xf32>
      %20 = tpu.matmul %18, %19, %cst_17 {dimension_numbers = #tpu.dot_dimension_numbers<[1], [0], [0], [1], [0, 0, 1, 1], [], []>} : vector<2x128xbf16>, vector<128x128xbf16>, vector<2x128xf32> -> vector<2x128xf32>
      %c0_18 = arith.constant 0 : index
      %c0_19 = arith.constant 0 : index
      %21 = vector.load %arg5[%c0_18, %c0_19] : memref<1x128xf32, #tpu.memory_space<vmem>>, vector<1x128xf32>
      %22 = vector.broadcast %21 : vector<1x128xf32> to vector<2x128xf32>
      %23 = arith.addf %20, %22 : vector<2x128xf32>
      %cst_20 = arith.constant 0.000000e+00 : f32
      %24 = vector.broadcast %cst_20 : f32 to vector<2x128xf32>
      %25 = arith.maximumf %23, %24 : vector<2x128xf32>
      %26 = arith.truncf %25 : vector<2x128xf32> to vector<2x128xbf16>
      %c0_21 = arith.constant 0 : index
      %c0_22 = arith.constant 0 : index
      %27 = vector.load %arg6[%c0_21, %c0_22] : memref<128x128xbf16, #tpu.memory_space<vmem>>, vector<128x128xbf16>
      %cst_23 = arith.constant dense<0.000000e+00> : vector<2x128xf32>
      %28 = tpu.matmul %26, %27, %cst_23 {dimension_numbers = #tpu.dot_dimension_numbers<[1], [0], [0], [1], [0, 0, 1, 1], [], []>} : vector<2x128xbf16>, vector<128x128xbf16>, vector<2x128xf32> -> vector<2x128xf32>
      %c0_24 = arith.constant 0 : index
      %c0_25 = arith.constant 0 : index
      %29 = vector.load %arg7[%c0_24, %c0_25] : memref<1x128xf32, #tpu.memory_space<vmem>>, vector<1x128xf32>
      %30 = vector.broadcast %29 : vector<1x128xf32> to vector<2x128xf32>
      %31 = arith.addf %28, %30 : vector<2x128xf32>
      %c0_26 = arith.constant 0 : index
      %c0_27 = arith.constant 0 : index
      %32 = vector.load %arg8[%c0_26, %c0_27] : memref<2x128xf32, #tpu.memory_space<vmem>>, vector<2x128xf32>
      tpu.vector_store %arg8[%c0_26, %c0_27], %31 {strides = array<i32>} : memref<2x128xf32, #tpu.memory_space<vmem>>, vector<2x128xf32>,
    } else {
    }
    return
  }
  func.func @transform_0(%arg0: i32) -> (i32, i32) {
    %c0_i32 = arith.constant 0 : i32
    %c0_i32_0 = arith.constant 0 : i32
    return %c0_i32, %arg0 : i32, i32
  }
  func.func @transform_1(%arg0: i32) -> (i32, i32) {
    %c0_i32 = arith.constant 0 : i32
    %c0_i32_0 = arith.constant 0 : i32
    return %arg0, %c0_i32 : i32, i32
  }
  func.func @transform_2(%arg0: i32) -> (i32, i32) {
    %c0_i32 = arith.constant 0 : i32
    %c0_i32_0 = arith.constant 0 : i32
    %c0_i32_1 = arith.constant 0 : i32
    return %c0_i32, %c0_i32_0 : i32, i32
  }
  func.func @transform_3(%arg0: i32) -> (i32, i32) {
    %c0_i32 = arith.constant 0 : i32
    %c0_i32_0 = arith.constant 0 : i32
    %c0_i32_1 = arith.constant 0 : i32
    return %c0_i32, %c0_i32_0 : i32, i32
  }
  func.func @transform_4(%arg0: i32) -> (i32, i32) {
    %c0_i32 = arith.constant 0 : i32
    %c0_i32_0 = arith.constant 0 : i32
    %c0_i32_1 = arith.constant 0 : i32
    return %c0_i32, %c0_i32_0 : i32, i32
  }
  func.func @transform_5(%arg0: i32) -> (i32, i32) {
    %c0_i32 = arith.constant 0 : i32
    %c0_i32_0 = arith.constant 0 : i32
    %c0_i32_1 = arith.constant 0 : i32
    return %c0_i32, %c0_i32_0 : i32, i32
  }
  func.func @transform_6(%arg0: i32) -> (i32, i32) {
    %c0_i32 = arith.constant 0 : i32
    %c0_i32_0 = arith.constant 0 : i32
    %c0_i32_1 = arith.constant 0 : i32
    return %c0_i32, %c0_i32_0 : i32, i32
  }
  func.func @transform_7(%arg0: i32) -> (i32, i32) {
    %c0_i32 = arith.constant 0 : i32
    %c0_i32_0 = arith.constant 0 : i32
    %c0_i32_1 = arith.constant 0 : i32
    return %c0_i32, %c0_i32_0 : i32, i32
  }
}

module attributes {stable_mosaic.version = 11 : i64} {
  func.func @_conv_tower_kernel(%arg0: i32, %arg1: i32, %arg2: memref<1x1x64x1xf32, #tpu.memory_space<vmem>>, %arg3: memref<1x1x64x1xf32, #tpu.memory_space<vmem>>, %arg4: memref<1x1x64x1xf32, #tpu.memory_space<vmem>>, %arg5: memref<1x1x64x1xf32, #tpu.memory_space<vmem>>, %arg6: memref<7x32xf32, #tpu.memory_space<vmem>>, %arg7: memref<1x32xf32, #tpu.memory_space<vmem>>, %arg8: memref<224x32xf32, #tpu.memory_space<vmem>>, %arg9: memref<1x32xf32, #tpu.memory_space<vmem>>, %arg10: memref<1x1x2x32xf32, #tpu.memory_space<vmem>>, %arg11: memref<58x32xf32, #tpu.memory_space<vmem>>, %arg12: memref<19x32xf32, #tpu.memory_space<vmem>>, %arg13: memref<7x224xf32, #tpu.memory_space<vmem>>, %arg14: memref<7x32xf32, #tpu.memory_space<vmem>>) attributes {dimension_semantics = [#tpu.dimension_semantics<parallel>, #tpu.dimension_semantics<parallel>], iteration_bounds = array<i64: 2, 1>, scalar_prefetch = 0 : i64, scratch_operands = 4 : i64, tpu.core_type = #tpu.core_type<tc>, window_params = [{transform_indices = @transform_0, window_bounds = array<i64: 1, 1, 64, 1>}, {transform_indices = @transform_1, window_bounds = array<i64: 1, 1, 64, 1>}, {transform_indices = @transform_2, window_bounds = array<i64: 1, 1, 64, 1>}, {transform_indices = @transform_3, window_bounds = array<i64: 1, 1, 64, 1>}, {pipeline_mode = #tpu.pipeline_mode<synchronous>, transform_indices = @transform_4, window_bounds = array<i64: 7, 32>}, {pipeline_mode = #tpu.pipeline_mode<synchronous>, transform_indices = @transform_5, window_bounds = array<i64: 1, 32>}, {pipeline_mode = #tpu.pipeline_mode<synchronous>, transform_indices = @transform_6, window_bounds = array<i64: 224, 32>}, {pipeline_mode = #tpu.pipeline_mode<synchronous>, transform_indices = @transform_7, window_bounds = array<i64: 1, 32>}, {transform_indices = @transform_8, window_bounds = array<i64: 1, 1, 2, 32>}]} {
    %c0 = arith.constant 0 : index
    %c0_0 = arith.constant 0 : index
    %0 = vector.load %arg6[%c0, %c0_0] : memref<7x32xf32, #tpu.memory_space<vmem>>, vector<7x32xf32>
    %c0_1 = arith.constant 0 : index
    %c0_2 = arith.constant 0 : index
    %c0_3 = arith.constant 0 : index
    %c0_4 = arith.constant 0 : index
    %1 = vector.load %arg2[%c0_1, %c0_2, %c0_3, %c0_4] : memref<1x1x64x1xf32, #tpu.memory_space<vmem>>, vector<1x1x64x1xf32>
    %2 = vector.shape_cast %1 : vector<1x1x64x1xf32> to vector<64x1xf32>
    %3 = vector.extract_strided_slice %2 {offsets = [0, 0], sizes = [58, 1], strides = [1, 1]} : vector<64x1xf32> to vector<58x1xf32>
    %4 = vector.extract_strided_slice %0 {offsets = [0, 0], sizes = [1, 32], strides = [1, 1]} : vector<7x32xf32> to vector<1x32xf32>
    %5 = vector.broadcast %3 : vector<58x1xf32> to vector<58x32xf32>
    %6 = vector.broadcast %4 : vector<1x32xf32> to vector<58x32xf32>
    %7 = arith.mulf %5, %6 : vector<58x32xf32>
    %8 = vector.extract_strided_slice %2 {offsets = [1, 0], sizes = [58, 1], strides = [1, 1]} : vector<64x1xf32> to vector<58x1xf32>
    %9 = vector.extract_strided_slice %0 {offsets = [1, 0], sizes = [1, 32], strides = [1, 1]} : vector<7x32xf32> to vector<1x32xf32>
    %10 = vector.broadcast %8 : vector<58x1xf32> to vector<58x32xf32>
    %11 = vector.broadcast %9 : vector<1x32xf32> to vector<58x32xf32>
    %12 = arith.mulf %10, %11 : vector<58x32xf32>
    %13 = arith.addf %7, %12 : vector<58x32xf32>
    %14 = vector.extract_strided_slice %2 {offsets = [2, 0], sizes = [58, 1], strides = [1, 1]} : vector<64x1xf32> to vector<58x1xf32>
    %15 = vector.extract_strided_slice %0 {offsets = [2, 0], sizes = [1, 32], strides = [1, 1]} : vector<7x32xf32> to vector<1x32xf32>
    %16 = vector.broadcast %14 : vector<58x1xf32> to vector<58x32xf32>
    %17 = vector.broadcast %15 : vector<1x32xf32> to vector<58x32xf32>
    %18 = arith.mulf %16, %17 : vector<58x32xf32>
    %19 = arith.addf %13, %18 : vector<58x32xf32>
    %20 = vector.extract_strided_slice %2 {offsets = [3, 0], sizes = [58, 1], strides = [1, 1]} : vector<64x1xf32> to vector<58x1xf32>
    %21 = vector.extract_strided_slice %0 {offsets = [3, 0], sizes = [1, 32], strides = [1, 1]} : vector<7x32xf32> to vector<1x32xf32>
    %22 = vector.broadcast %20 : vector<58x1xf32> to vector<58x32xf32>
    %23 = vector.broadcast %21 : vector<1x32xf32> to vector<58x32xf32>
    %24 = arith.mulf %22, %23 : vector<58x32xf32>
    %25 = arith.addf %19, %24 : vector<58x32xf32>
    %26 = vector.extract_strided_slice %2 {offsets = [4, 0], sizes = [58, 1], strides = [1, 1]} : vector<64x1xf32> to vector<58x1xf32>
    %27 = vector.extract_strided_slice %0 {offsets = [4, 0], sizes = [1, 32], strides = [1, 1]} : vector<7x32xf32> to vector<1x32xf32>
    %28 = vector.broadcast %26 : vector<58x1xf32> to vector<58x32xf32>
    %29 = vector.broadcast %27 : vector<1x32xf32> to vector<58x32xf32>
    %30 = arith.mulf %28, %29 : vector<58x32xf32>
    %31 = arith.addf %25, %30 : vector<58x32xf32>
    %32 = vector.extract_strided_slice %2 {offsets = [5, 0], sizes = [58, 1], strides = [1, 1]} : vector<64x1xf32> to vector<58x1xf32>
    %33 = vector.extract_strided_slice %0 {offsets = [5, 0], sizes = [1, 32], strides = [1, 1]} : vector<7x32xf32> to vector<1x32xf32>
    %34 = vector.broadcast %32 : vector<58x1xf32> to vector<58x32xf32>
    %35 = vector.broadcast %33 : vector<1x32xf32> to vector<58x32xf32>
    %36 = arith.mulf %34, %35 : vector<58x32xf32>
    %37 = arith.addf %31, %36 : vector<58x32xf32>
    %38 = vector.extract_strided_slice %2 {offsets = [6, 0], sizes = [58, 1], strides = [1, 1]} : vector<64x1xf32> to vector<58x1xf32>
    %39 = vector.extract_strided_slice %0 {offsets = [6, 0], sizes = [1, 32], strides = [1, 1]} : vector<7x32xf32> to vector<1x32xf32>
    %40 = vector.broadcast %38 : vector<58x1xf32> to vector<58x32xf32>
    %41 = vector.broadcast %39 : vector<1x32xf32> to vector<58x32xf32>
    %42 = arith.mulf %40, %41 : vector<58x32xf32>
    %43 = arith.addf %37, %42 : vector<58x32xf32>
    %c0_5 = arith.constant 0 : index
    %c0_6 = arith.constant 0 : index
    %c0_7 = arith.constant 0 : index
    %c0_8 = arith.constant 0 : index
    %44 = vector.load %arg3[%c0_5, %c0_6, %c0_7, %c0_8] : memref<1x1x64x1xf32, #tpu.memory_space<vmem>>, vector<1x1x64x1xf32>
    %45 = vector.shape_cast %44 : vector<1x1x64x1xf32> to vector<64x1xf32>
    %46 = vector.extract_strided_slice %45 {offsets = [0, 0], sizes = [58, 1], strides = [1, 1]} : vector<64x1xf32> to vector<58x1xf32>
    %47 = vector.extract_strided_slice %0 {offsets = [0, 0], sizes = [1, 32], strides = [1, 1]} : vector<7x32xf32> to vector<1x32xf32>
    %48 = vector.broadcast %46 : vector<58x1xf32> to vector<58x32xf32>
    %49 = vector.broadcast %47 : vector<1x32xf32> to vector<58x32xf32>
    %50 = arith.mulf %48, %49 : vector<58x32xf32>
    %51 = vector.extract_strided_slice %45 {offsets = [1, 0], sizes = [58, 1], strides = [1, 1]} : vector<64x1xf32> to vector<58x1xf32>
    %52 = vector.extract_strided_slice %0 {offsets = [1, 0], sizes = [1, 32], strides = [1, 1]} : vector<7x32xf32> to vector<1x32xf32>
    %53 = vector.broadcast %51 : vector<58x1xf32> to vector<58x32xf32>
    %54 = vector.broadcast %52 : vector<1x32xf32> to vector<58x32xf32>
    %55 = arith.mulf %53, %54 : vector<58x32xf32>
    %56 = arith.addf %50, %55 : vector<58x32xf32>
    %57 = vector.extract_strided_slice %45 {offsets = [2, 0], sizes = [58, 1], strides = [1, 1]} : vector<64x1xf32> to vector<58x1xf32>
    %58 = vector.extract_strided_slice %0 {offsets = [2, 0], sizes = [1, 32], strides = [1, 1]} : vector<7x32xf32> to vector<1x32xf32>
    %59 = vector.broadcast %57 : vector<58x1xf32> to vector<58x32xf32>
    %60 = vector.broadcast %58 : vector<1x32xf32> to vector<58x32xf32>
    %61 = arith.mulf %59, %60 : vector<58x32xf32>
    %62 = arith.addf %56, %61 : vector<58x32xf32>
    %63 = vector.extract_strided_slice %45 {offsets = [3, 0], sizes = [58, 1], strides = [1, 1]} : vector<64x1xf32> to vector<58x1xf32>
    %64 = vector.extract_strided_slice %0 {offsets = [3, 0], sizes = [1, 32], strides = [1, 1]} : vector<7x32xf32> to vector<1x32xf32>
    %65 = vector.broadcast %63 : vector<58x1xf32> to vector<58x32xf32>
    %66 = vector.broadcast %64 : vector<1x32xf32> to vector<58x32xf32>
    %67 = arith.mulf %65, %66 : vector<58x32xf32>
    %68 = arith.addf %62, %67 : vector<58x32xf32>
    %69 = vector.extract_strided_slice %45 {offsets = [4, 0], sizes = [58, 1], strides = [1, 1]} : vector<64x1xf32> to vector<58x1xf32>
    %70 = vector.extract_strided_slice %0 {offsets = [4, 0], sizes = [1, 32], strides = [1, 1]} : vector<7x32xf32> to vector<1x32xf32>
    %71 = vector.broadcast %69 : vector<58x1xf32> to vector<58x32xf32>
    %72 = vector.broadcast %70 : vector<1x32xf32> to vector<58x32xf32>
    %73 = arith.mulf %71, %72 : vector<58x32xf32>
    %74 = arith.addf %68, %73 : vector<58x32xf32>
    %75 = vector.extract_strided_slice %45 {offsets = [5, 0], sizes = [58, 1], strides = [1, 1]} : vector<64x1xf32> to vector<58x1xf32>
    %76 = vector.extract_strided_slice %0 {offsets = [5, 0], sizes = [1, 32], strides = [1, 1]} : vector<7x32xf32> to vector<1x32xf32>
    %77 = vector.broadcast %75 : vector<58x1xf32> to vector<58x32xf32>
    %78 = vector.broadcast %76 : vector<1x32xf32> to vector<58x32xf32>
    %79 = arith.mulf %77, %78 : vector<58x32xf32>
    %80 = arith.addf %74, %79 : vector<58x32xf32>
    %81 = vector.extract_strided_slice %45 {offsets = [6, 0], sizes = [58, 1], strides = [1, 1]} : vector<64x1xf32> to vector<58x1xf32>
    %82 = vector.extract_strided_slice %0 {offsets = [6, 0], sizes = [1, 32], strides = [1, 1]} : vector<7x32xf32> to vector<1x32xf32>
    %83 = vector.broadcast %81 : vector<58x1xf32> to vector<58x32xf32>
    %84 = vector.broadcast %82 : vector<1x32xf32> to vector<58x32xf32>
    %85 = arith.mulf %83, %84 : vector<58x32xf32>
    %86 = arith.addf %80, %85 : vector<58x32xf32>
    %87 = arith.maximumf %43, %86 : vector<58x32xf32>
    %c0_9 = arith.constant 0 : index
    %c0_10 = arith.constant 0 : index
    %c0_11 = arith.constant 0 : index
    %c0_12 = arith.constant 0 : index
    %88 = vector.load %arg4[%c0_9, %c0_10, %c0_11, %c0_12] : memref<1x1x64x1xf32, #tpu.memory_space<vmem>>, vector<1x1x64x1xf32>
    %89 = vector.shape_cast %88 : vector<1x1x64x1xf32> to vector<64x1xf32>
    %90 = vector.extract_strided_slice %89 {offsets = [0, 0], sizes = [58, 1], strides = [1, 1]} : vector<64x1xf32> to vector<58x1xf32>
    %91 = vector.extract_strided_slice %0 {offsets = [0, 0], sizes = [1, 32], strides = [1, 1]} : vector<7x32xf32> to vector<1x32xf32>
    %92 = vector.broadcast %90 : vector<58x1xf32> to vector<58x32xf32>
    %93 = vector.broadcast %91 : vector<1x32xf32> to vector<58x32xf32>
    %94 = arith.mulf %92, %93 : vector<58x32xf32>
    %95 = vector.extract_strided_slice %89 {offsets = [1, 0], sizes = [58, 1], strides = [1, 1]} : vector<64x1xf32> to vector<58x1xf32>
    %96 = vector.extract_strided_slice %0 {offsets = [1, 0], sizes = [1, 32], strides = [1, 1]} : vector<7x32xf32> to vector<1x32xf32>
    %97 = vector.broadcast %95 : vector<58x1xf32> to vector<58x32xf32>
    %98 = vector.broadcast %96 : vector<1x32xf32> to vector<58x32xf32>
    %99 = arith.mulf %97, %98 : vector<58x32xf32>
    %100 = arith.addf %94, %99 : vector<58x32xf32>
    %101 = vector.extract_strided_slice %89 {offsets = [2, 0], sizes = [58, 1], strides = [1, 1]} : vector<64x1xf32> to vector<58x1xf32>
    %102 = vector.extract_strided_slice %0 {offsets = [2, 0], sizes = [1, 32], strides = [1, 1]} : vector<7x32xf32> to vector<1x32xf32>
    %103 = vector.broadcast %101 : vector<58x1xf32> to vector<58x32xf32>
    %104 = vector.broadcast %102 : vector<1x32xf32> to vector<58x32xf32>
    %105 = arith.mulf %103, %104 : vector<58x32xf32>
    %106 = arith.addf %100, %105 : vector<58x32xf32>
    %107 = vector.extract_strided_slice %89 {offsets = [3, 0], sizes = [58, 1], strides = [1, 1]} : vector<64x1xf32> to vector<58x1xf32>
    %108 = vector.extract_strided_slice %0 {offsets = [3, 0], sizes = [1, 32], strides = [1, 1]} : vector<7x32xf32> to vector<1x32xf32>
    %109 = vector.broadcast %107 : vector<58x1xf32> to vector<58x32xf32>
    %110 = vector.broadcast %108 : vector<1x32xf32> to vector<58x32xf32>
    %111 = arith.mulf %109, %110 : vector<58x32xf32>
    %112 = arith.addf %106, %111 : vector<58x32xf32>
    %113 = vector.extract_strided_slice %89 {offsets = [4, 0], sizes = [58, 1], strides = [1, 1]} : vector<64x1xf32> to vector<58x1xf32>
    %114 = vector.extract_strided_slice %0 {offsets = [4, 0], sizes = [1, 32], strides = [1, 1]} : vector<7x32xf32> to vector<1x32xf32>
    %115 = vector.broadcast %113 : vector<58x1xf32> to vector<58x32xf32>
    %116 = vector.broadcast %114 : vector<1x32xf32> to vector<58x32xf32>
    %117 = arith.mulf %115, %116 : vector<58x32xf32>
    %118 = arith.addf %112, %117 : vector<58x32xf32>
    %119 = vector.extract_strided_slice %89 {offsets = [5, 0], sizes = [58, 1], strides = [1, 1]} : vector<64x1xf32> to vector<58x1xf32>
    %120 = vector.extract_strided_slice %0 {offsets = [5, 0], sizes = [1, 32], strides = [1, 1]} : vector<7x32xf32> to vector<1x32xf32>
    %121 = vector.broadcast %119 : vector<58x1xf32> to vector<58x32xf32>
    %122 = vector.broadcast %120 : vector<1x32xf32> to vector<58x32xf32>
    %123 = arith.mulf %121, %122 : vector<58x32xf32>
    %124 = arith.addf %118, %123 : vector<58x32xf32>
    %125 = vector.extract_strided_slice %89 {offsets = [6, 0], sizes = [58, 1], strides = [1, 1]} : vector<64x1xf32> to vector<58x1xf32>
    %126 = vector.extract_strided_slice %0 {offsets = [6, 0], sizes = [1, 32], strides = [1, 1]} : vector<7x32xf32> to vector<1x32xf32>
    %127 = vector.broadcast %125 : vector<58x1xf32> to vector<58x32xf32>
    %128 = vector.broadcast %126 : vector<1x32xf32> to vector<58x32xf32>
    %129 = arith.mulf %127, %128 : vector<58x32xf32>
    %130 = arith.addf %124, %129 : vector<58x32xf32>
    %131 = arith.maximumf %87, %130 : vector<58x32xf32>
    %c0_13 = arith.constant 0 : index
    %c0_14 = arith.constant 0 : index
    %c0_15 = arith.constant 0 : index
    %c0_16 = arith.constant 0 : index
    %132 = vector.load %arg5[%c0_13, %c0_14, %c0_15, %c0_16] : memref<1x1x64x1xf32, #tpu.memory_space<vmem>>, vector<1x1x64x1xf32>
    %133 = vector.shape_cast %132 : vector<1x1x64x1xf32> to vector<64x1xf32>
    %134 = vector.extract_strided_slice %133 {offsets = [0, 0], sizes = [58, 1], strides = [1, 1]} : vector<64x1xf32> to vector<58x1xf32>
    %135 = vector.extract_strided_slice %0 {offsets = [0, 0], sizes = [1, 32], strides = [1, 1]} : vector<7x32xf32> to vector<1x32xf32>
    %136 = vector.broadcast %134 : vector<58x1xf32> to vector<58x32xf32>
    %137 = vector.broadcast %135 : vector<1x32xf32> to vector<58x32xf32>
    %138 = arith.mulf %136, %137 : vector<58x32xf32>
    %139 = vector.extract_strided_slice %133 {offsets = [1, 0], sizes = [58, 1], strides = [1, 1]} : vector<64x1xf32> to vector<58x1xf32>
    %140 = vector.extract_strided_slice %0 {offsets = [1, 0], sizes = [1, 32], strides = [1, 1]} : vector<7x32xf32> to vector<1x32xf32>
    %141 = vector.broadcast %139 : vector<58x1xf32> to vector<58x32xf32>
    %142 = vector.broadcast %140 : vector<1x32xf32> to vector<58x32xf32>
    %143 = arith.mulf %141, %142 : vector<58x32xf32>
    %144 = arith.addf %138, %143 : vector<58x32xf32>
    %145 = vector.extract_strided_slice %133 {offsets = [2, 0], sizes = [58, 1], strides = [1, 1]} : vector<64x1xf32> to vector<58x1xf32>
    %146 = vector.extract_strided_slice %0 {offsets = [2, 0], sizes = [1, 32], strides = [1, 1]} : vector<7x32xf32> to vector<1x32xf32>
    %147 = vector.broadcast %145 : vector<58x1xf32> to vector<58x32xf32>
    %148 = vector.broadcast %146 : vector<1x32xf32> to vector<58x32xf32>
    %149 = arith.mulf %147, %148 : vector<58x32xf32>
    %150 = arith.addf %144, %149 : vector<58x32xf32>
    %151 = vector.extract_strided_slice %133 {offsets = [3, 0], sizes = [58, 1], strides = [1, 1]} : vector<64x1xf32> to vector<58x1xf32>
    %152 = vector.extract_strided_slice %0 {offsets = [3, 0], sizes = [1, 32], strides = [1, 1]} : vector<7x32xf32> to vector<1x32xf32>
    %153 = vector.broadcast %151 : vector<58x1xf32> to vector<58x32xf32>
    %154 = vector.broadcast %152 : vector<1x32xf32> to vector<58x32xf32>
    %155 = arith.mulf %153, %154 : vector<58x32xf32>
    %156 = arith.addf %150, %155 : vector<58x32xf32>
    %157 = vector.extract_strided_slice %133 {offsets = [4, 0], sizes = [58, 1], strides = [1, 1]} : vector<64x1xf32> to vector<58x1xf32>
    %158 = vector.extract_strided_slice %0 {offsets = [4, 0], sizes = [1, 32], strides = [1, 1]} : vector<7x32xf32> to vector<1x32xf32>
    %159 = vector.broadcast %157 : vector<58x1xf32> to vector<58x32xf32>
    %160 = vector.broadcast %158 : vector<1x32xf32> to vector<58x32xf32>
    %161 = arith.mulf %159, %160 : vector<58x32xf32>
    %162 = arith.addf %156, %161 : vector<58x32xf32>
    %163 = vector.extract_strided_slice %133 {offsets = [5, 0], sizes = [58, 1], strides = [1, 1]} : vector<64x1xf32> to vector<58x1xf32>
    %164 = vector.extract_strided_slice %0 {offsets = [5, 0], sizes = [1, 32], strides = [1, 1]} : vector<7x32xf32> to vector<1x32xf32>
    %165 = vector.broadcast %163 : vector<58x1xf32> to vector<58x32xf32>
    %166 = vector.broadcast %164 : vector<1x32xf32> to vector<58x32xf32>
    %167 = arith.mulf %165, %166 : vector<58x32xf32>
    %168 = arith.addf %162, %167 : vector<58x32xf32>
    %169 = vector.extract_strided_slice %133 {offsets = [6, 0], sizes = [58, 1], strides = [1, 1]} : vector<64x1xf32> to vector<58x1xf32>
    %170 = vector.extract_strided_slice %0 {offsets = [6, 0], sizes = [1, 32], strides = [1, 1]} : vector<7x32xf32> to vector<1x32xf32>
    %171 = vector.broadcast %169 : vector<58x1xf32> to vector<58x32xf32>
    %172 = vector.broadcast %170 : vector<1x32xf32> to vector<58x32xf32>
    %173 = arith.mulf %171, %172 : vector<58x32xf32>
    %174 = arith.addf %168, %173 : vector<58x32xf32>
    %175 = arith.maximumf %131, %174 : vector<58x32xf32>
    %c0_17 = arith.constant 0 : index
    %c0_18 = arith.constant 0 : index
    %176 = vector.load %arg7[%c0_17, %c0_18] : memref<1x32xf32, #tpu.memory_space<vmem>>, vector<1x32xf32>
    %177 = vector.broadcast %176 : vector<1x32xf32> to vector<58x32xf32>
    %178 = arith.addf %175, %177 : vector<58x32xf32>
    %cst = arith.constant 0.000000e+00 : f32
    %179 = vector.broadcast %cst : f32 to vector<58x32xf32>
    %180 = arith.maximumf %178, %179 : vector<58x32xf32>
    %c0_19 = arith.constant 0 : index
    %c0_20 = arith.constant 0 : index
    %181 = vector.load %arg11[%c0_19, %c0_20] : memref<58x32xf32, #tpu.memory_space<vmem>>, vector<58x32xf32>
    tpu.vector_store %arg11[%c0_19, %c0_20], %180 {strides = array<i32>} : memref<58x32xf32, #tpu.memory_space<vmem>>, vector<58x32xf32>,
    %c0_21 = arith.constant 0 : index
    %c0_22 = arith.constant 0 : index
    %182 = tpu.strided_load %arg11[%c0_21, %c0_22] {strides = array<i32: 3, 1>} : memref<58x32xf32, #tpu.memory_space<vmem>>, vector<19x32xf32>
    %c1 = arith.constant 1 : index
    %c0_23 = arith.constant 0 : index
    %183 = tpu.strided_load %arg11[%c1, %c0_23] {strides = array<i32: 3, 1>} : memref<58x32xf32, #tpu.memory_space<vmem>>, vector<19x32xf32>
    %184 = arith.maximumf %182, %183 : vector<19x32xf32>
    %c2 = arith.constant 2 : index
    %c0_24 = arith.constant 0 : index
    %185 = tpu.strided_load %arg11[%c2, %c0_24] {strides = array<i32: 3, 1>} : memref<58x32xf32, #tpu.memory_space<vmem>>, vector<19x32xf32>
    %186 = arith.maximumf %184, %185 : vector<19x32xf32>
    %c0_25 = arith.constant 0 : index
    %c0_26 = arith.constant 0 : index
    %187 = vector.load %arg12[%c0_25, %c0_26] : memref<19x32xf32, #tpu.memory_space<vmem>>, vector<19x32xf32>
    tpu.vector_store %arg12[%c0_25, %c0_26], %186 {strides = array<i32>} : memref<19x32xf32, #tpu.memory_space<vmem>>, vector<19x32xf32>,
    %c0_27 = arith.constant 0 : index
    %c0_28 = arith.constant 0 : index
    %188 = tpu.strided_load %arg12[%c0_27, %c0_28] {strides = array<i32: 2, 1>} : memref<19x32xf32, #tpu.memory_space<vmem>>, vector<10x32xf32>
    %c1_29 = arith.constant 1 : index
    %c0_30 = arith.constant 0 : index
    %189 = tpu.strided_load %arg12[%c1_29, %c0_30] {strides = array<i32: 2, 1>} : memref<19x32xf32, #tpu.memory_space<vmem>>, vector<9x32xf32>
    %190 = vector.extract_strided_slice %188 {offsets = [0, 0], sizes = [7, 32], strides = [1, 1]} : vector<10x32xf32> to vector<7x32xf32>
    %c0_31 = arith.constant 0 : index
    %c0_32 = arith.constant 0 : index
    %191 = vector.load %arg13[%c0_31, %c0_32] : memref<7x224xf32, #tpu.memory_space<vmem>>, vector<7x32xf32>
    tpu.vector_store %arg13[%c0_31, %c0_32], %190 {strides = array<i32>} : memref<7x224xf32, #tpu.memory_space<vmem>>, vector<7x32xf32>,
    %192 = vector.extract_strided_slice %189 {offsets = [0, 0], sizes = [7, 32], strides = [1, 1]} : vector<9x32xf32> to vector<7x32xf32>
    %c0_33 = arith.constant 0 : index
    %c32 = arith.constant 32 : index
    %193 = vector.load %arg13[%c0_33, %c32] : memref<7x224xf32, #tpu.memory_space<vmem>>, vector<7x32xf32>
    tpu.vector_store %arg13[%c0_33, %c32], %192 {strides = array<i32>} : memref<7x224xf32, #tpu.memory_space<vmem>>, vector<7x32xf32>,
    %194 = vector.extract_strided_slice %188 {offsets = [1, 0], sizes = [7, 32], strides = [1, 1]} : vector<10x32xf32> to vector<7x32xf32>
    %c0_34 = arith.constant 0 : index
    %c64 = arith.constant 64 : index
    %195 = vector.load %arg13[%c0_34, %c64] : memref<7x224xf32, #tpu.memory_space<vmem>>, vector<7x32xf32>
    tpu.vector_store %arg13[%c0_34, %c64], %194 {strides = array<i32>} : memref<7x224xf32, #tpu.memory_space<vmem>>, vector<7x32xf32>,
    %196 = vector.extract_strided_slice %189 {offsets = [1, 0], sizes = [7, 32], strides = [1, 1]} : vector<9x32xf32> to vector<7x32xf32>
    %c0_35 = arith.constant 0 : index
    %c96 = arith.constant 96 : index
    %197 = vector.load %arg13[%c0_35, %c96] : memref<7x224xf32, #tpu.memory_space<vmem>>, vector<7x32xf32>
    tpu.vector_store %arg13[%c0_35, %c96], %196 {strides = array<i32>} : memref<7x224xf32, #tpu.memory_space<vmem>>, vector<7x32xf32>,
    %198 = vector.extract_strided_slice %188 {offsets = [2, 0], sizes = [7, 32], strides = [1, 1]} : vector<10x32xf32> to vector<7x32xf32>
    %c0_36 = arith.constant 0 : index
    %c128 = arith.constant 128 : index
    %199 = vector.load %arg13[%c0_36, %c128] : memref<7x224xf32, #tpu.memory_space<vmem>>, vector<7x32xf32>
    tpu.vector_store %arg13[%c0_36, %c128], %198 {strides = array<i32>} : memref<7x224xf32, #tpu.memory_space<vmem>>, vector<7x32xf32>,
    %200 = vector.extract_strided_slice %189 {offsets = [2, 0], sizes = [7, 32], strides = [1, 1]} : vector<9x32xf32> to vector<7x32xf32>
    %c0_37 = arith.constant 0 : index
    %c160 = arith.constant 160 : index
    %201 = vector.load %arg13[%c0_37, %c160] : memref<7x224xf32, #tpu.memory_space<vmem>>, vector<7x32xf32>
    tpu.vector_store %arg13[%c0_37, %c160], %200 {strides = array<i32>} : memref<7x224xf32, #tpu.memory_space<vmem>>, vector<7x32xf32>,
    %202 = vector.extract_strided_slice %188 {offsets = [3, 0], sizes = [7, 32], strides = [1, 1]} : vector<10x32xf32> to vector<7x32xf32>
    %c0_38 = arith.constant 0 : index
    %c192 = arith.constant 192 : index
    %203 = vector.load %arg13[%c0_38, %c192] : memref<7x224xf32, #tpu.memory_space<vmem>>, vector<7x32xf32>
    tpu.vector_store %arg13[%c0_38, %c192], %202 {strides = array<i32>} : memref<7x224xf32, #tpu.memory_space<vmem>>, vector<7x32xf32>,
    %c0_39 = arith.constant 0 : index
    %c0_40 = arith.constant 0 : index
    %204 = vector.load %arg13[%c0_39, %c0_40] : memref<7x224xf32, #tpu.memory_space<vmem>>, vector<7x224xf32>
    %c0_41 = arith.constant 0 : index
    %c0_42 = arith.constant 0 : index
    %205 = vector.load %arg8[%c0_41, %c0_42] : memref<224x32xf32, #tpu.memory_space<vmem>>, vector<224x32xf32>
    %cst_43 = arith.constant dense<0.000000e+00> : vector<7x32xf32>
    %206 = tpu.matmul %204, %205, %cst_43 {dimension_numbers = #tpu.dot_dimension_numbers<[1], [0], [0], [1], [0, 0, 1, 1], [], []>} : vector<7x224xf32>, vector<224x32xf32>, vector<7x32xf32> -> vector<7x32xf32>
    %c0_44 = arith.constant 0 : index
    %c0_45 = arith.constant 0 : index
    %207 = vector.load %arg9[%c0_44, %c0_45] : memref<1x32xf32, #tpu.memory_space<vmem>>, vector<1x32xf32>
    %208 = vector.broadcast %207 : vector<1x32xf32> to vector<7x32xf32>
    %209 = arith.addf %206, %208 : vector<7x32xf32>
    %cst_46 = arith.constant 0.000000e+00 : f32
    %210 = vector.broadcast %cst_46 : f32 to vector<7x32xf32>
    %211 = arith.maximumf %209, %210 : vector<7x32xf32>
    %c0_47 = arith.constant 0 : index
    %c0_48 = arith.constant 0 : index
    %212 = vector.load %arg14[%c0_47, %c0_48] : memref<7x32xf32, #tpu.memory_space<vmem>>, vector<7x32xf32>
    tpu.vector_store %arg14[%c0_47, %c0_48], %211 {strides = array<i32>} : memref<7x32xf32, #tpu.memory_space<vmem>>, vector<7x32xf32>,
    %c0_49 = arith.constant 0 : index
    %c0_50 = arith.constant 0 : index
    %213 = tpu.strided_load %arg14[%c0_49, %c0_50] {strides = array<i32: 3, 1>} : memref<7x32xf32, #tpu.memory_space<vmem>>, vector<2x32xf32>
    %c1_51 = arith.constant 1 : index
    %c0_52 = arith.constant 0 : index
    %214 = tpu.strided_load %arg14[%c1_51, %c0_52] {strides = array<i32: 3, 1>} : memref<7x32xf32, #tpu.memory_space<vmem>>, vector<2x32xf32>
    %215 = arith.maximumf %213, %214 : vector<2x32xf32>
    %c2_53 = arith.constant 2 : index
    %c0_54 = arith.constant 0 : index
    %216 = tpu.strided_load %arg14[%c2_53, %c0_54] {strides = array<i32: 3, 1>} : memref<7x32xf32, #tpu.memory_space<vmem>>, vector<2x32xf32>
    %217 = arith.maximumf %215, %216 : vector<2x32xf32>
    %c0_55 = arith.constant 0 : index
    %c0_56 = arith.constant 0 : index
    %c0_57 = arith.constant 0 : index
    %c0_58 = arith.constant 0 : index
    %218 = vector.load %arg10[%c0_55, %c0_56, %c0_57, %c0_58] : memref<1x1x2x32xf32, #tpu.memory_space<vmem>>, vector<1x1x2x32xf32>
    %219 = vector.shape_cast %218 : vector<1x1x2x32xf32> to vector<2x32xf32>
    %220 = vector.shape_cast %217 : vector<2x32xf32> to vector<1x1x2x32xf32>
    tpu.vector_store %arg10[%c0_55, %c0_56, %c0_57, %c0_58], %220 {strides = array<i32>} : memref<1x1x2x32xf32, #tpu.memory_space<vmem>>, vector<1x1x2x32xf32>,
    return
  }
  func.func @transform_0(%arg0: i32, %arg1: i32) -> (i32, i32, i32, i32) {
    %c2_i32 = arith.constant 2 : i32
    %0 = arith.muli %c2_i32, %arg1 : i32
    %c0_i32 = arith.constant 0 : i32
    %1 = arith.addi %0, %c0_i32 : i32
    %c0_i32_0 = arith.constant 0 : i32
    %c0_i32_1 = arith.constant 0 : i32
    %c0_i32_2 = arith.constant 0 : i32
    return %arg0, %1, %c0_i32_0, %c0_i32_1 : i32, i32, i32, i32
  }
  func.func @transform_1(%arg0: i32, %arg1: i32) -> (i32, i32, i32, i32) {
    %c2_i32 = arith.constant 2 : i32
    %0 = arith.muli %c2_i32, %arg1 : i32
    %c1_i32 = arith.constant 1 : i32
    %1 = arith.addi %0, %c1_i32 : i32
    %c0_i32 = arith.constant 0 : i32
    %c0_i32_0 = arith.constant 0 : i32
    %c0_i32_1 = arith.constant 0 : i32
    return %arg0, %1, %c0_i32, %c0_i32_0 : i32, i32, i32, i32
  }
  func.func @transform_2(%arg0: i32, %arg1: i32) -> (i32, i32, i32, i32) {
    %c2_i32 = arith.constant 2 : i32
    %0 = arith.muli %c2_i32, %arg1 : i32
    %c2_i32_0 = arith.constant 2 : i32
    %1 = arith.addi %0, %c2_i32_0 : i32
    %c0_i32 = arith.constant 0 : i32
    %c0_i32_1 = arith.constant 0 : i32
    %c0_i32_2 = arith.constant 0 : i32
    return %arg0, %1, %c0_i32, %c0_i32_1 : i32, i32, i32, i32
  }
  func.func @transform_3(%arg0: i32, %arg1: i32) -> (i32, i32, i32, i32) {
    %c2_i32 = arith.constant 2 : i32
    %0 = arith.muli %c2_i32, %arg1 : i32
    %c3_i32 = arith.constant 3 : i32
    %1 = arith.addi %0, %c3_i32 : i32
    %c0_i32 = arith.constant 0 : i32
    %c0_i32_0 = arith.constant 0 : i32
    %c0_i32_1 = arith.constant 0 : i32
    return %arg0, %1, %c0_i32, %c0_i32_0 : i32, i32, i32, i32
  }
  func.func @transform_4(%arg0: i32, %arg1: i32) -> (i32, i32) {
    %c0_i32 = arith.constant 0 : i32
    %c0_i32_0 = arith.constant 0 : i32
    %c0_i32_1 = arith.constant 0 : i32
    return %c0_i32, %c0_i32_0 : i32, i32
  }
  func.func @transform_5(%arg0: i32, %arg1: i32) -> (i32, i32) {
    %c0_i32 = arith.constant 0 : i32
    %c0_i32_0 = arith.constant 0 : i32
    %c0_i32_1 = arith.constant 0 : i32
    return %c0_i32, %c0_i32_0 : i32, i32
  }
  func.func @transform_6(%arg0: i32, %arg1: i32) -> (i32, i32) {
    %c0_i32 = arith.constant 0 : i32
    %c0_i32_0 = arith.constant 0 : i32
    %c0_i32_1 = arith.constant 0 : i32
    return %c0_i32, %c0_i32_0 : i32, i32
  }
  func.func @transform_7(%arg0: i32, %arg1: i32) -> (i32, i32) {
    %c0_i32 = arith.constant 0 : i32
    %c0_i32_0 = arith.constant 0 : i32
    %c0_i32_1 = arith.constant 0 : i32
    return %c0_i32, %c0_i32_0 : i32, i32
  }
  func.func @transform_8(%arg0: i32, %arg1: i32) -> (i32, i32, i32, i32) {
    %c0_i32 = arith.constant 0 : i32
    %c0_i32_0 = arith.constant 0 : i32
    %c0_i32_1 = arith.constant 0 : i32
    return %arg0, %arg1, %c0_i32, %c0_i32_0 : i32, i32, i32, i32
  }
}

</mosaic_0001>

<bundles_post_ra>
// kernel: cnn_forward.3
= control target key start
LH: loop header
LB: loop body
LE: loop exit
PB: predicated region body
PF: predicated region fallthrough
CT: control target
= control target key end

     0   :  { %v523_v0 = vmov 0.0   ;;  %vm524_vm0 = vmmov 0   ;;  %s683_s1 = inlined_call_operand.vmem [shape: bf16[128,128], index: 1, kind: input, shape index: {}]   ;;  %s684_s3 = inlined_call_operand.vmem [shape: bf16[128,128], index: 3, kind: input, shape index: {}]   ;;  %s685_s0 = inlined_call_operand.vmem [shape: bf16[2,128], index: 0, kind: input, shape index: {}]   ;;  %s686_s5 = inlined_call_operand.vmem [shape: bf16[128,128], index: 5, kind: input, shape index: {}]   ;;  %s687_s2 = inlined_call_operand.vmem [shape: f32[1,128], index: 2, kind: input, shape index: {}]   ;;  %s688_s4 = inlined_call_operand.vmem [shape: f32[1,128], index: 4, kind: input, shape index: {}]   ;;  %s689_s6 = inlined_call_operand.vmem [shape: f32[1,128], index: 6, kind: input, shape index: {}]   ;;  %s690_s7 = inlined_call_operand.vmem [shape: f32[2,128], index: 7, kind: output, shape index: {}]  }
   0x1   :  { %437 = vmatprep.subr.bf16.mxu0 %v523_v0  ;;  %31 = vst [vmem:[#allocation2] sm:$0x3] %v523_v0  ;;  %v499_v1 = vld [vmem:[%s683_s1] sm:$0xff]   ;;  %453 = vmatprep.mubr.msk.bf16.mxu0 %vm524_vm0, %v523_v0  ;;  %v500_v2 = vld [vmem:[%s683_s1 + $0x8] sm:$0xff]   ;;  %v501_v3 = vld [vmem:[%s683_s1 + $0x10] sm:$0xff]  }
   0x2   :  { %457 = vmatprep.subr.bf16.mxu1 %v523_v0  ;;  %473 = vmatprep.mubr.msk.bf16.mxu1 %vm524_vm0, %v523_v0  ;;  %v507_v4 = vld [vmem:[%s684_s3] sm:$0xff]   ;;  %v502_v5 = vld [vmem:[%s683_s1 + $0x18] sm:$0xff]   ;;  %v508_v6 = vld [vmem:[%s684_s3 + $0x8] sm:$0xff]  }
   0x3   :  { %438 = vmatpush3.bf16.msra.mxu0 %v499_v1  ;;  %458 = vmatpush3.bf16.msra.mxu1 %v507_v4  ;;  %v503_v7 = vld [vmem:[%s683_s1 + $0x20] sm:$0xff]   ;;  %v509_v8 = vld [vmem:[%s684_s3 + $0x10] sm:$0xff]   ;;  %v504_v9 = vld [vmem:[%s683_s1 + $0x28] sm:$0xff]  }
   0x4   :  { %439 = vmatprep.subr.bf16.mxu0 %v523_v0  ;;  %459 = vmatprep.subr.bf16.mxu1 %v523_v0  ;;  %v510_v10 = vld [vmem:[%s684_s3 + $0x18] sm:$0xff]   ;;  %v505_v11 = vld [vmem:[%s683_s1 + $0x30] sm:$0xff]   ;;  %v33_v13 = vld [vmem:[%s685_s0] sm:$0x1] }
   0x5   :  { %v506_v12 = vld [vmem:[%s683_s1 + $0x38] sm:$0xff]   ;;  %v511_v14 = vld [vmem:[%s684_s3 + $0x20] sm:$0xff]   ;;  %v512_v15 = vld [vmem:[%s684_s3 + $0x28] sm:$0xff]  }
   0x6   :  { %v513_v16 = vld [vmem:[%s684_s3 + $0x30] sm:$0xff]   ;;  %v514_v17 = vld [vmem:[%s684_s3 + $0x38] sm:$0xff]   ;;  %v515_v18 = vld [vmem:[%s686_s5] sm:$0xff]  }
   0x7   :  { %440 = vmatpush3.bf16.msra.mxu0 %v500_v2  ;;  %460 = vmatpush3.bf16.msra.mxu1 %v508_v6  ;;  %v516_v19 = vld [vmem:[%s686_s5 + $0x8] sm:$0xff]   ;;  %v517_v20 = vld [vmem:[%s686_s5 + $0x10] sm:$0xff]   ;;  %v518_v21 = vld [vmem:[%s686_s5 + $0x18] sm:$0xff]  }
   0x8   :  { %441 = vmatprep.subr.bf16.mxu0 %v523_v0  ;;  %461 = vmatprep.subr.bf16.mxu1 %v523_v0  ;;  %v519_v22 = vld [vmem:[%s686_s5 + $0x20] sm:$0xff]   ;;  %v520_v23 = vld [vmem:[%s686_s5 + $0x28] sm:$0xff]   ;;  %v521_v35 = vld [vmem:[%s686_s5 + $0x30] sm:$0xff]  }
   0x9   :  { %v32_v24 = vld [vmem:[#allocation2] sm:$0x3]  ;;  %v522_v36 = vld [vmem:[%s686_s5 + $0x38] sm:$0xff]  }
   0xa   :  { %v391_v30 = vld [vmem:[%s687_s2] ss:$0 sm:$0xff] }
   0xb   :  { %442 = vmatpush3.bf16.msra.mxu0 %v501_v3  ;;  %462 = vmatpush3.bf16.msra.mxu1 %v509_v8  ;;  %v392_v37 = vld [vmem:[%s688_s4] ss:$0 sm:$0xff] }
   0xc   :  { %443 = vmatprep.subr.bf16.mxu0 %v523_v0  ;;  %463 = vmatprep.subr.bf16.mxu1 %v523_v0  ;;  %v401_v45 = vld [vmem:[%s689_s6] ss:$0 sm:$0xff] }
   0xf   :  { %444 = vmatpush3.bf16.msra.mxu0 %v502_v5  ;;  %464 = vmatpush3.bf16.msra.mxu1 %v510_v10 }
  0x10   :  { %445 = vmatprep.subr.bf16.mxu0 %v523_v0  ;;  %465 = vmatprep.subr.bf16.mxu1 %v523_v0 }
  0x13   :  { %446 = vmatpush3.bf16.msra.mxu0 %v503_v7  ;;  %466 = vmatpush3.bf16.msra.mxu1 %v511_v14 }
  0x14   :  { %447 = vmatprep.subr.bf16.mxu0 %v523_v0  ;;  %467 = vmatprep.subr.bf16.mxu1 %v523_v0 }
  0x17   :  { %448 = vmatpush3.bf16.msra.mxu0 %v504_v9  ;;  %468 = vmatpush3.bf16.msra.mxu1 %v512_v15 }
  0x18   :  { %449 = vmatprep.subr.bf16.mxu0 %v523_v0  ;;  %469 = vmatprep.subr.bf16.mxu1 %v523_v0 }
  0x1b   :  { %450 = vmatpush3.bf16.msra.mxu0 %v505_v11  ;;  %470 = vmatpush3.bf16.msra.mxu1 %v513_v16 }
  0x1c   :  { %451 = vmatprep.subr.bf16.mxu0 %v523_v0  ;;  %471 = vmatprep.subr.bf16.mxu1 %v523_v0 }
  0x1f   :  { %452 = vmatpush3.bf16.msra.mxu0 %v506_v12  ;;  %472 = vmatpush3.bf16.msra.mxu1 %v514_v17 }
  0x20   :  { %477 = vmatprep.subr.bf16.mxu0 %v523_v0 }
  0x22   :  { %454 = vmatmul.mubr.bf16.vlgmr.msra.gmra.mrb[0].mxu0 %v33_v13 }
  0x23   :  { %493 = vmatprep.mubr.msk.bf16.mxu0 %vm524_vm0, %v523_v0  ;;  %478 = vmatpush3.bf16.msra.mxu0 %v515_v18 }
  0x24   :  { %479 = vmatprep.subr.bf16.mxu0 %v523_v0 }
  0x27   :  { %480 = vmatpush3.bf16.msra.mxu0 %v516_v19 }
  0x28   :  { %481 = vmatprep.subr.bf16.mxu0 %v523_v0 }
  0x2b   :  { %482 = vmatpush3.bf16.msra.mxu0 %v517_v20 }
  0x2c   :  { %483 = vmatprep.subr.bf16.mxu0 %v523_v0 }
  0x2f   :  { %484 = vmatpush3.bf16.msra.mxu0 %v518_v21 }
  0x30   :  { %485 = vmatprep.subr.bf16.mxu0 %v523_v0 }
  0x33   :  { %486 = vmatpush3.bf16.msra.mxu0 %v519_v22 }
  0x34   :  { %487 = vmatprep.subr.bf16.mxu0 %v523_v0 }
  0x37   :  { %488 = vmatpush3.bf16.msra.mxu0 %v520_v23 }
  0x38   :  { %489 = vmatprep.subr.bf16.mxu0 %v523_v0 }
  0x3b   :  { %490 = vmatpush3.bf16.msra.mxu0 %v521_v35 }
  0x3c   :  { %491 = vmatprep.subr.bf16.mxu0 %v523_v0 }
  0x3f   :  { %492 = vmatpush3.bf16.msra.mxu0 %v522_v36 }
  0xf5   :  { %v132_v25 = vpop.f32.mrb[0].mxu0 }
  0xf6   :  { %v138_v26 = vadd.f32 %v132_v25, %v32_v24  ;;  %v455_v27 = vpop.f32.mrb[1].mxu0 }
  0xf7   :  { %v135_v28 = vpop.f32.mrb[2].mxu0 }
  0xf8   :  { %139 = vst [vmem:[#allocation2] sm:$0x3] %v138_v26  ;;  %v456_v29 = vpop.f32.mrb[3].mxu0 }
  0xff   :  { %v143_v31 = vld [vmem:[#allocation2] sm:$0x3] }
 0x100   :  { %v151_v32 = vadd.f32 %v391_v30, %v143_v31 }
 0x102   :  { %v152_v33 = vmax.f32 %v151_v32, 0.0 }
 0x104   :  { %v153_v34 = vpack.c.bf16 %v152_v33, %v152_v33 }
 0x106   :  { %474 = vmatmul.mubr.bf16.vlgmr.msra.gmra.mrb[0].mxu1 %v153_v34 }
 0x1d9   :  { %v259_v38 = vpop.f32.mrb[0].mxu1 }
 0x1da   :  { %v260_v39 = vadd.f32 %v392_v37, %v259_v38  ;;  %v475_v40 = vpop.f32.mrb[1].mxu1 }
 0x1db   :  { %v262_v41 = vpop.f32.mrb[2].mxu1 }
 0x1dc   :  { %v265_v42 = vmax.f32 %v260_v39, 0.0  ;;  %v476_v43 = vpop.f32.mrb[3].mxu1 }
 0x1de   :  { %v266_v44 = vpack.c.bf16 %v265_v42, %v265_v42 }
 0x1e0   :  { %494 = vmatmul.mubr.bf16.vlgmr.msra.gmra.mrb[4].mxu0 %v266_v44 }
 0x2b3   :  { %v372_v46 = vpop.f32.mrb[4].mxu0 }
 0x2b4   :  { %v373_v47 = vadd.f32 %v401_v45, %v372_v46  ;;  %v495_v48 = vpop.f32.mrb[5].mxu0 }
 0x2b5   :  { %v375_v49 = vpop.f32.mrb[6].mxu0 }
 0x2b6   :  { %378 = vst [vmem:[%s690_s7] sm:$0x3] %v373_v47  ;;  %v496_v50 = vpop.f32.mrb[7].mxu0 }

// kernel: cnn_forward.2
= control target key start
LH: loop header
LB: loop body
LE: loop exit
PB: predicated region body
PF: predicated region fallthrough
CT: control target
= control target key end

     0   :  { %s2444_s27 = smov 0   ;;  %s2446_s28 = smov 0   ;;  %s3681_s0 = inlined_call_operand.vmem [shape: f32[2,5,64,1], index: 0, kind: input, shape index: {}, may-alias: {0,1,2,3}]   ;;  %s3682_s1 = inlined_call_operand.vmem [shape: f32[2,5,64,1], index: 1, kind: input, shape index: {}, may-alias: {0,1,2,3}]   ;;  %s3683_s2 = inlined_call_operand.vmem [shape: f32[2,5,64,1], index: 2, kind: input, shape index: {}, may-alias: {0,1,2,3}]   ;;  %s3684_s3 = inlined_call_operand.vmem [shape: f32[2,5,64,1], index: 3, kind: input, shape index: {}, may-alias: {0,1,2,3}]   ;;  %s3685_s4 = inlined_call_operand.vmem [shape: f32[7,32], index: 4, kind: input, shape index: {}]   ;;  %s3686_s5 = inlined_call_operand.vmem [shape: f32[1,32], index: 5, kind: input, shape index: {}]   ;;  %s3687_s6 = inlined_call_operand.vmem [shape: f32[224,32], index: 6, kind: input, shape index: {}]   ;;  %s3688_s7 = inlined_call_operand.vmem [shape: f32[1,32], index: 7, kind: input, shape index: {}]   ;;  %s3689_s8 = inlined_call_operand.vmem [shape: f32[2,1,2,32], index: 8, kind: output, shape index: {}]  }
   0x1   :  { %s2448_s29 = smov 0  }
   0x2 LB: > { %s30_s30 = sadd.s32 1, %s2388_s28  ;;  %p2277_p0 = scmp.ge.s32.totalorder %s2392_s29, 1  ;;  %s2392_s29 = sphi %s2448_s29, %s18_s29   ;;  %s2388_s28 = sphi %s2446_s28, %s3721_s28   ;;  %s2384_s27 = sphi %s2444_s27, %s3720_s27  }
   0x3   : > { %p32_p1 = scmp.ge.s32.totalorder %s30_s30, 2  ;;  %p358_p2 = scmp.lt.s32.totalorder %s2392_s29, 3 }
   0x5   : > { %s3723_s30 = smov (%p32_p1, %s30_s30), 0  ;;  %p359_p3 = pnand %p2277_p0, %p358_p2 }
   0x6   : > { %p433_p4 = scmp.lt.s32.totalorder (!%p359_p3), %s2384_s27, 1  ;;  %v2394_v0 = vmov (!%p359_p3), 0   ;;  %v538_v33 = vlaneseq (!%p359_p3)  ;;  %v489_v38 = vld [vmem:[%s3685_s4] sm:$0x7f] (!%p359_p3)  ;;  %vm570_vm0 = vcmask (!%p359_p3), 1046528   ;;  %vm622_vm1 = vcmask (!%p359_p3), 1045504  }
   0x7   : > { %362 = sbr.rel (%p359_p3) target bundleno = 742 (0x2e6), region = 52  ;;  %2369 = vset.pattern.permute.xlu1 (!%p359_p3), %v2394_v0  ;;  %2368 = vset.pattern.permute.xlu0 (!%p359_p3), %v2394_v0  ;;  %vm674_vm2 = vcmask (!%p359_p3), 1044480   ;;  %vm726_vm3 = vcmask (!%p359_p3), 1043456   ;;  %vm778_vm4 = vcmask (!%p359_p3), 1042432   ;;  %vm830_vm5 = vcmask (!%p359_p3), 1041408   ;;  %s2396_s15 = smov (!%p359_p3), 32  }
   0x8   : > { %v539_v34 = vshrl.u32 (!%p359_p3), %v538_v33, 7  ;;  %vm1923_vm6 = vcmask (!%p359_p3), 261120   ;;  %vm1931_vm7 = vcmask (!%p359_p3), 254976   ;;  %vm1958_vm8 = vcmask (!%p359_p3), 256000   ;;  %s2398_s25 = smov (!%p359_p3), 96  }
   0x9   : > { %vm1967_vm9 = vcmask (!%p359_p3), 260096   ;;  %vm1973_vm10 = vcmask (!%p359_p3), 522496   ;;  %vm1980_vm11 = vcmask (!%p359_p3), 784896   ;;  %vm1986_vm12 = vcmask (!%p359_p3), 1047296  }
   0xa   : > { %v552_v35 = vsub.s32 (!%p359_p3), 1, %v539_v34  ;;  %v604_v36 = vsub.s32 (!%p359_p3), 2, %v539_v34  ;;  %v656_v37 = vsub.s32 (!%p359_p3), 3, %v539_v34  ;;  %v708_v39 = vsub.s32 (!%p359_p3), 4, %v539_v34 }
   0xb   : > { %v760_v40 = vsub.s32 (!%p359_p3), 5, %v539_v34  ;;  %v812_v41 = vsub.s32 (!%p359_p3), 6, %v539_v34  ;;  %v540_v42 = vsub.s32 (!%p359_p3), 0, %v539_v34  ;;  %vm2046_vm13 = vcmask (!%p359_p3), 785408  }
   0xc   : > { %v2486_v43 = vrot.slane (!%p359_p3), %v489_v38, %v552_v35  ;;  %v2488_v44 = vrot.slane (!%p359_p3), %v489_v38, %v604_v36  ;;  %v2490_v45 = vrot.slane (!%p359_p3), %v489_v38, %v656_v37  ;;  %v2492_v46 = vrot.slane (!%p359_p3), %v489_v38, %v708_v39 }
   0xd   : > { %v2494_v47 = vrot.slane (!%p359_p3), %v489_v38, %v760_v40  ;;  %v2496_v48 = vrot.slane (!%p359_p3), %v489_v38, %v812_v41  ;;  %v2498_v49 = vrot.slane (!%p359_p3), %v489_v38, %v540_v42 }
   0xe   : > { %s3725_s27 = smov (!%p433_p4, %s2384_s27), 1 }
   0xf   : > { %s2465_s9 = smul.u32 320, %s3725_s27  ;;  %s2282_s18 = sshll.u32 %s3725_s27, 1 }
  0x11   : > { %s441_s12 = scalar_lea.vmem %s3681_s0, %s2465_s9  ;;  %s2289_s13 = sadd.s32 64, %s2465_s9 }
  0x12   : > { %v492_v1 = vld [vmem:[%s441_s12 + $0x10] sm:$0xff]  ;;  %v490_v2 = vld [vmem:[%s441_s12] sm:$0xff]  ;;  %v493_v3 = vld [vmem:[%s441_s12 + $0x18] sm:$0xff]  ;;  %s453_s16 = scalar_lea.vmem %s3682_s1, %s2289_s13  ;;  %s2291_s17 = sadd.s32 128, %s2465_s9 }
  0x13   : > { %510 = vperm.xlu1 %2369, %v492_v1   ;;  %500 = vperm.xlu0 %2368, %v490_v2   ;;  %v491_v4 = vld [vmem:[%s441_s12 + $0x8] sm:$0xff]  ;;  %v494_v6 = vld [vmem:[%s441_s12 + $0x20] sm:$0xff]  ;;  %v497_v7 = vld [vmem:[%s441_s12 + $0x38] sm:$0xff]  ;;  %s466_s20 = scalar_lea.vmem %s3683_s2, %s2291_s17  ;;  %s2293_s21 = sadd.s32 192, %s2465_s9 }
  0x14   : > { %v495_v5 = vld [vmem:[%s441_s12 + $0x28] sm:$0xff]  ;;  %v496_v8 = vld [vmem:[%s441_s12 + $0x30] sm:$0xff]  ;;  %v862_v10 = vld [vmem:[%s453_s16] sm:$0xff]  ;;  %s479_s24 = scalar_lea.vmem %s3684_s3, %s2293_s21  ;;  %s488_s21 = scalar_lea.vmem %s3689_s8, %s2282_s18 }
  0x15   : > { %v863_v9 = vld [vmem:[%s453_s16 + $0x8] sm:$0xff]  ;;  %v865_v11 = vld [vmem:[%s453_s16 + $0x18] sm:$0xff]  ;;  %v864_v12 = vld [vmem:[%s453_s16 + $0x10] sm:$0xff] }
  0x16   : > { %v867_v13 = vld [vmem:[%s453_s16 + $0x28] sm:$0xff]  ;;  %v866_v14 = vld [vmem:[%s453_s16 + $0x20] sm:$0xff]  ;;  %v869_v15 = vld [vmem:[%s453_s16 + $0x38] sm:$0xff] }
  0x17   : > { %515 = vperm.xlu1 %2369, %v493_v3   ;;  %505 = vperm.xlu0 %2368, %v491_v4   ;;  %v868_v16 = vld [vmem:[%s453_s16 + $0x30] sm:$0xff]  ;;  %v1209_v17 = vld [vmem:[%s466_s20 + $0x8] sm:$0xff]  ;;  %v1208_v18 = vld [vmem:[%s466_s20] sm:$0xff] }
  0x18   : > { %v1211_v19 = vld [vmem:[%s466_s20 + $0x18] sm:$0xff]  ;;  %v1210_v20 = vld [vmem:[%s466_s20 + $0x10] sm:$0xff]  ;;  %v1213_v21 = vld [vmem:[%s466_s20 + $0x28] sm:$0xff] }
  0x19   : > { %v1212_v22 = vld [vmem:[%s466_s20 + $0x20] sm:$0xff]  ;;  %v1215_v23 = vld [vmem:[%s466_s20 + $0x38] sm:$0xff]  ;;  %v1214_v24 = vld [vmem:[%s466_s20 + $0x30] sm:$0xff]  ;;  %s2397_s20 = smov 64  }
  0x1a   : > { %v1555_v25 = vld [vmem:[%s479_s24 + $0x8] sm:$0xff]  ;;  %v1554_v26 = vld [vmem:[%s479_s24] sm:$0xff]  ;;  %v1557_v27 = vld [vmem:[%s479_s24 + $0x18] sm:$0xff] }
  0x1b   : > { %525 = vperm.xlu1 %2369, %v495_v5   ;;  %520 = vperm.xlu0 %2368, %v494_v6   ;;  %v1556_v28 = vld [vmem:[%s479_s24 + $0x10] sm:$0xff]  ;;  %v1559_v29 = vld [vmem:[%s479_s24 + $0x28] sm:$0xff]  ;;  %v1558_v30 = vld [vmem:[%s479_s24 + $0x20] sm:$0xff] }
  0x1c   : > { %v1561_v31 = vld [vmem:[%s479_s24 + $0x38] sm:$0xff]  ;;  %v1560_v32 = vld [vmem:[%s479_s24 + $0x30] sm:$0xff] }
  0x1f   : > { %535 = vperm.xlu1 %2369, %v497_v7   ;;  %530 = vperm.xlu0 %2368, %v496_v8  }
  0x23   : > { %877 = vperm.xlu1 %2369, %v863_v9   ;;  %872 = vperm.xlu0 %2368, %v862_v10  }
  0x27   : > { %887 = vperm.xlu1 %2369, %v865_v11   ;;  %882 = vperm.xlu0 %2368, %v864_v12  }
  0x2b   : > { %897 = vperm.xlu1 %2369, %v867_v13   ;;  %892 = vperm.xlu0 %2368, %v866_v14  }
  0x2f   : > { %907 = vperm.xlu1 %2369, %v869_v15   ;;  %902 = vperm.xlu0 %2368, %v868_v16  }
  0x33   : > { %1223 = vperm.xlu1 %2369, %v1209_v17   ;;  %1218 = vperm.xlu0 %2368, %v1208_v18  }
  0x37   : > { %1233 = vperm.xlu1 %2369, %v1211_v19   ;;  %1228 = vperm.xlu0 %2368, %v1210_v20  }
  0x3b   : > { %1243 = vperm.xlu1 %2369, %v1213_v21   ;;  %1238 = vperm.xlu0 %2368, %v1212_v22  }
  0x3f   : > { %1253 = vperm.xlu1 %2369, %v1215_v23   ;;  %1248 = vperm.xlu0 %2368, %v1214_v24  }
  0x43   : > { %1569 = vperm.xlu1 %2369, %v1555_v25   ;;  %1564 = vperm.xlu0 %2368, %v1554_v26  }
  0x47   : > { %1579 = vperm.xlu1 %2369, %v1557_v27   ;;  %1574 = vperm.xlu0 %2368, %v1556_v28  }
  0x4b   : > { %1589 = vperm.xlu1 %2369, %v1559_v29   ;;  %1584 = vperm.xlu0 %2368, %v1558_v30  }
  0x4f   : > { %1599 = vperm.xlu1 %2369, %v1561_v31   ;;  %1594 = vperm.xlu0 %2368, %v1560_v32  }
  0x92   : > { %v511_v50 = vpop.permute.xlu1 %510  ;;  %v501_v51 = vpop.permute.xlu0 %500 }
  0x93   : > { %v556_v52 = vmul.f32 %v2486_v43, %v511_v50  ;;  %v2502_v53 = vmul.f32 %v2488_v44, %v511_v50  ;;  %v2505_v54 = vmul.f32 %v2490_v45, %v511_v50  ;;  %v2508_v55 = vmul.f32 %v2492_v46, %v511_v50 }
  0x94   : > { %v2511_v56 = vmul.f32 %v2494_v47, %v511_v50  ;;  %v2514_v57 = vmul.f32 %v2496_v48, %v511_v50  ;;  %v554_v58 = vmul.f32 %v2486_v43, %v501_v51  ;;  %v544_v59 = vmul.f32 %v2498_v49, %v511_v50 }
  0x95   : > { %v542_v60 = vmul.f32 %v2498_v49, %v501_v51  ;;  %v574_v62 = vrot.slane %v556_v52, 1  ;;  %v626_v63 = vrot.slane %v2502_v53, 2  ;;  %v678_v0 = vrot.slane %v2505_v54, 3 }
  0x96   : > { %v516_v61 = vpop.permute.xlu1 %515  ;;  %v606_v1 = vmul.f32 %v2488_v44, %v501_v51  ;;  %v730_v2 = vrot.slane %v2508_v55, 4  ;;  %v782_v3 = vrot.slane %v2511_v56, 5  ;;  %v834_v4 = vrot.slane %v2514_v57, 6  ;;  %v506_v10 = vpop.permute.xlu0 %505 }
  0x97   : > { %v2526_v5 = vmul.f32 %v2486_v43, %v516_v61  ;;  %v571_v6 = vrot.slane %v554_v58, 1  ;;  %v658_v7 = vmul.f32 %v2490_v45, %v501_v51  ;;  %v710_v8 = vmul.f32 %v2492_v46, %v501_v51 }
  0x98   : > { %v2531_v9 = vmul.f32 %v2488_v44, %v516_v61  ;;  %v2534_v11 = vmul.f32 %v2494_v47, %v501_v51  ;;  %v2538_v13 = vmul.f32 %v2490_v45, %v516_v61  ;;  %v2541_v14 = vmul.f32 %v2492_v46, %v516_v61 }
  0x99   : > { %v576_v12 = vrot.slane %v2526_v5, 1  ;;  %v623_v15 = vrot.slane %v606_v1, 2  ;;  %v2544_v16 = vmul.f32 %v2496_v48, %v501_v51  ;;  %v2548_v18 = vmul.f32 %v2494_v47, %v516_v61 }
  0x9a   : > { %v628_v17 = vrot.slane %v2531_v9, 2  ;;  %v680_v20 = vrot.slane %v2538_v13, 3  ;;  %v732_v21 = vrot.slane %v2541_v14, 4  ;;  %v555_v22 = vmul.f32 %v2486_v43, %v506_v10 }
  0x9b   : > { %v577_v19 = vsel %vm570_vm0, %v574_v62, %v576_v12  ;;  %v675_v23 = vrot.slane %v658_v7, 3  ;;  %v2557_v25 = vmul.f32 %v2496_v48, %v516_v61  ;;  %v543_v26 = vmul.f32 %v2498_v49, %v506_v10 }
  0x9c   : > { %v596_v24 = vadd.f32 %v577_v19, %v544_v59  ;;  %v629_v27 = vsel %vm622_vm1, %v626_v63, %v628_v17  ;;  %v784_v28 = vrot.slane %v2548_v18, 5  ;;  %v572_v29 = vrot.slane %v555_v22, 1 }
  0x9d   : > { %v607_v30 = vmul.f32 %v2488_v44, %v506_v10  ;;  %v681_v32 = vsel %vm674_vm2, %v678_v0, %v680_v20  ;;  %v733_v33 = vsel %vm726_vm3, %v730_v2, %v732_v21  ;;  %v659_v34 = vmul.f32 %v2490_v45, %v506_v10 }
  0x9e   : > { %v648_v31 = vadd.f32 %v629_v27, %v596_v24  ;;  %v573_v35 = vsel %vm570_vm0, %v571_v6, %v572_v29  ;;  %v575_v36 = vsel %vm570_vm0, %v572_v29, %v574_v62  ;;  %v711_v38 = vmul.f32 %v2492_v46, %v506_v10  ;;  %v526_v62 = vpop.permute.xlu1 %525 }
  0x9f   : > { %v624_v37 = vrot.slane %v607_v30, 2  ;;  %v594_v40 = vadd.f32 %v573_v35, %v542_v60  ;;  %v595_v41 = vadd.f32 %v575_v36, %v543_v26  ;;  %v676_v42 = vrot.slane %v659_v34, 3 }
  0xa0   : > { %v700_v39 = vadd.f32 %v681_v32, %v648_v31  ;;  %v728_v52 = vrot.slane %v711_v38, 4  ;;  %v763_v53 = vmul.f32 %v2494_v47, %v506_v10  ;;  %v836_v58 = vrot.slane %v2557_v25, 6 }
  0xa1   : > { %v625_v50 = vsel %vm622_vm1, %v623_v15, %v624_v37  ;;  %v627_v51 = vsel %vm622_vm1, %v624_v37, %v626_v63  ;;  %v727_v6 = vrot.slane %v710_v8, 4  ;;  %v545_v7 = vmul.f32 %v2498_v49, %v516_v61 }
  0xa2   : > { %v752_v54 = vadd.f32 %v733_v33, %v700_v39  ;;  %v646_v59 = vadd.f32 %v625_v50, %v594_v40  ;;  %v647_v1 = vadd.f32 %v627_v51, %v595_v41  ;;  %v785_v60 = vsel %vm778_vm4, %v782_v3, %v784_v28 }
  0xa3   : > { %v677_v63 = vsel %vm674_vm2, %v675_v23, %v676_v42  ;;  %v679_v19 = vsel %vm674_vm2, %v676_v42, %v678_v0  ;;  %v780_v24 = vrot.slane %v763_v53, 5  ;;  %v729_v27 = vsel %vm726_vm3, %v727_v6, %v728_v52  ;;  %v536_v6 = vpop.permute.xlu1 %535 }
  0xa4   : > { %v804_v15 = vadd.f32 %v785_v60, %v752_v54  ;;  %v698_v22 = vadd.f32 %v677_v63, %v646_v59  ;;  %v699_v26 = vadd.f32 %v679_v19, %v647_v1  ;;  %v2591_v8 = vmul.f32 %v2496_v48, %v506_v10 }
  0xa5   : > { %v2594_v61 = vmul.f32 %v2486_v43, %v526_v62  ;;  %v779_v29 = vrot.slane %v2534_v11, 5  ;;  %v831_v30 = vrot.slane %v2544_v16, 6  ;;  %v837_v0 = vsel %vm830_vm5, %v834_v4, %v836_v58 }
  0xa6   : > { %v750_v23 = vadd.f32 %v729_v27, %v698_v22  ;;  %v731_v31 = vsel %vm726_vm3, %v728_v52, %v730_v2  ;;  %v2607_v10 = vmul.f32 %v2488_v44, %v526_v62  ;;  %v2610_v32 = vmul.f32 %v2490_v45, %v526_v62  ;;  %v521_v2 = vpop.permute.xlu0 %520 }
  0xa7   : > { %v2613_v11 = vmul.f32 %v2492_v46, %v526_v62  ;;  %v2615_v33 = vadd.f32 %v837_v0, %v804_v15  ;;  %v781_v34 = vsel %vm778_vm4, %v779_v29, %v780_v24  ;;  %v783_v35 = vsel %vm778_vm4, %v780_v24, %v782_v3 }
  0xa8   : > { %v2622_v55 = vmul.f32 %v2498_v49, %v526_v62  ;;  %v751_v36 = vadd.f32 %v731_v31, %v699_v26  ;;  %v832_v37 = vrot.slane %v2591_v8, 6  ;;  %v580_v38 = vrot.slane %v2594_v61, 1 }
  0xa9   : > { %v2627_v39 = vmul.f32 %v2494_v47, %v526_v62  ;;  %v2629_v40 = vadd.f32 %v781_v34, %v750_v23  ;;  %v632_v41 = vrot.slane %v2607_v10, 2  ;;  %v684_v56 = vrot.slane %v2610_v32, 3 }
  0xaa   : > { %v2634_v3 = vmul.f32 %v2496_v48, %v526_v62  ;;  %v736_v42 = vrot.slane %v2613_v11, 4  ;;  %v558_v50 = vmul.f32 %v2486_v43, %v521_v2  ;;  %v610_v51 = vmul.f32 %v2488_v44, %v521_v2 }
  0xab   : > { %v662_v52 = vmul.f32 %v2490_v45, %v521_v2  ;;  %v546_v53 = vmul.f32 %v2498_v49, %v521_v2  ;;  %v714_v54 = vmul.f32 %v2492_v46, %v521_v2  ;;  %v766_v59 = vmul.f32 %v2494_v47, %v521_v2 }
  0xac   : > { %v818_v1 = vmul.f32 %v2496_v48, %v521_v2  ;;  %v788_v62 = vrot.slane %v2627_v39, 5  ;;  %v578_v60 = vrot.slane %v558_v50, 1  ;;  %v630_v63 = vrot.slane %v610_v51, 2 }
  0xad   : > { %v682_v15 = vrot.slane %v662_v52, 3  ;;  %v840_v19 = vrot.slane %v2634_v3, 6  ;;  %v734_v22 = vrot.slane %v714_v54, 4  ;;  %v786_v24 = vrot.slane %v766_v59, 5 }
  0xae   : > { %v838_v26 = vrot.slane %v818_v1, 6  ;;  %v2646_v27 = vadd.f32 %v783_v35, %v751_v36  ;;  %v579_v29 = vsel %vm570_vm0, %v576_v12, %v578_v60  ;;  %v581_v0 = vsel %vm570_vm0, %v578_v60, %v580_v38 }
  0xaf   : > { %v561_v23 = vmul.f32 %v2486_v43, %v536_v6  ;;  %v597_v31 = vadd.f32 %v579_v29, %v545_v7  ;;  %v598_v34 = vadd.f32 %v581_v0, %v546_v53  ;;  %v631_v2 = vsel %vm622_vm1, %v628_v17, %v630_v63 }
  0xb0   : > { %v549_v50 = vmul.f32 %v2498_v49, %v536_v6  ;;  %v633_v5 = vsel %vm622_vm1, %v630_v63, %v632_v41  ;;  %v683_v12 = vsel %vm674_vm2, %v680_v20, %v682_v15  ;;  %v737_v35 = vsel %vm726_vm3, %v734_v22, %v736_v42  ;;  %v531_v63 = vpop.permute.xlu0 %530 }
  0xb1   : > { %v789_v9 = vsel %vm778_vm4, %v786_v24, %v788_v62  ;;  %v649_v7 = vadd.f32 %v631_v2, %v597_v31  ;;  %v650_v17 = vadd.f32 %v633_v5, %v598_v34  ;;  %v685_v36 = vsel %vm674_vm2, %v682_v15, %v684_v56 }
  0xb2   : > { %v841_v13 = vsel %vm830_vm5, %v838_v26, %v840_v19  ;;  %v584_v51 = vrot.slane %v561_v23, 1  ;;  %v613_v20 = vmul.f32 %v2488_v44, %v536_v6  ;;  %v665_v52 = vmul.f32 %v2490_v45, %v536_v6 }
  0xb3   : > { %v717_v53 = vmul.f32 %v2492_v46, %v536_v6  ;;  %v701_v54 = vadd.f32 %v683_v12, %v649_v7  ;;  %v702_v59 = vadd.f32 %v685_v36, %v650_v17  ;;  %v735_v1 = vsel %vm726_vm3, %v732_v21, %v734_v22 }
  0xb4   : > { %v787_v60 = vsel %vm778_vm4, %v784_v28, %v786_v24  ;;  %v839_v15 = vsel %vm830_vm5, %v836_v58, %v838_v26  ;;  %v601_v29 = vadd.f32 %v584_v51, %v549_v50  ;;  %v636_v0 = vrot.slane %v613_v20, 2 }
  0xb5   : > { %v769_v23 = vmul.f32 %v2494_v47, %v536_v6  ;;  %v753_v31 = vadd.f32 %v735_v1, %v701_v54  ;;  %v754_v34 = vadd.f32 %v737_v35, %v702_v59  ;;  %v688_v2 = vrot.slane %v665_v52, 3 }
  0xb6   : > { %v740_v5 = vrot.slane %v717_v53, 4  ;;  %v653_v14 = vadd.f32 %v636_v0, %v601_v29  ;;  %v548_v21 = vmul.f32 %v2498_v49, %v531_v63  ;;  %v560_v18 = vmul.f32 %v2486_v43, %v531_v63  ;;  %v878_v29 = vpop.permute.xlu1 %877 }
  0xb7   : > { %v612_v28 = vmul.f32 %v2488_v44, %v531_v63  ;;  %v805_v22 = vadd.f32 %v787_v60, %v753_v31  ;;  %v806_v24 = vadd.f32 %v789_v9, %v754_v34  ;;  %v664_v25 = vmul.f32 %v2490_v45, %v531_v63 }
  0xb8   : > { %v716_v58 = vmul.f32 %v2492_v46, %v531_v63  ;;  %v705_v26 = vadd.f32 %v688_v2, %v653_v14  ;;  %v582_v50 = vrot.slane %v560_v18, 1  ;;  %v768_v35 = vmul.f32 %v2494_v47, %v531_v63 }
  0xb9   : > { %v634_v12 = vrot.slane %v612_v28, 2  ;;  %v2696_v7 = vadd.f32 %v839_v15, %v805_v22  ;;  %v2698_v17 = vadd.f32 %v841_v13, %v806_v24  ;;  %v686_v36 = vrot.slane %v664_v25, 3  ;;  %v873_v28 = vpop.permute.xlu0 %872 }
  0xba   : > { %v738_v20 = vrot.slane %v716_v58, 4  ;;  %v792_v52 = vrot.slane %v769_v23, 5  ;;  %v821_v53 = vmul.f32 %v2496_v48, %v536_v6  ;;  %v583_v9 = vsel %vm570_vm0, %v580_v38, %v582_v50 }
  0xbb   : > { %v585_v54 = vsel %vm570_vm0, %v582_v50, %v584_v51  ;;  %v757_v59 = vadd.f32 %v740_v5, %v705_v26  ;;  %v599_v1 = vadd.f32 %v583_v9, %v2622_v55  ;;  %v637_v15 = vsel %vm622_vm1, %v634_v12, %v636_v0 }
  0xbc   : > { %v600_v60 = vadd.f32 %v585_v54, %v548_v21  ;;  %v635_v13 = vsel %vm622_vm1, %v632_v41, %v634_v12  ;;  %v689_v23 = vsel %vm674_vm2, %v686_v36, %v688_v2  ;;  %v739_v61 = vsel %vm726_vm3, %v736_v42, %v738_v20 }
  0xbd   : > { %v741_v38 = vsel %vm726_vm3, %v738_v20, %v740_v5  ;;  %v651_v6 = vadd.f32 %v635_v13, %v599_v1  ;;  %v790_v31 = vrot.slane %v768_v35, 5  ;;  %v820_v55 = vmul.f32 %v2496_v48, %v531_v63  ;;  %v2769_v35 = vpop.permute.xlu1 %887 }
  0xbe   : > { %v652_v51 = vadd.f32 %v637_v15, %v600_v60  ;;  %v844_v34 = vrot.slane %v821_v53, 6  ;;  %v687_v10 = vsel %vm674_vm2, %v684_v56, %v686_v36  ;;  %v2720_v41 = vmul.f32 %v878_v29, %v2486_v43 }
  0xbf   : > { %v2723_v0 = vmul.f32 %v878_v29, %v2488_v44  ;;  %v703_v11 = vadd.f32 %v687_v10, %v651_v6  ;;  %v791_v2 = vsel %vm778_vm4, %v788_v62, %v790_v31  ;;  %v793_v5 = vsel %vm778_vm4, %v790_v31, %v792_v52  ;;  %v883_v31 = vpop.permute.xlu0 %882 }
  0xc0   : > { %v704_v42 = vadd.f32 %v689_v23, %v652_v51  ;;  %v833_v32 = vsel %vm830_vm5, %v831_v30, %v832_v37  ;;  %v835_v56 = vsel %vm830_vm5, %v832_v37, %v834_v4  ;;  %v842_v63 = vrot.slane %v820_v55, 6 }
  0xc1   : > { %v2740_v14 = vmul.f32 %v878_v29, %v2490_v45  ;;  %v2743_v39 = vadd.f32 %v833_v32, %v2629_v40  ;;  %v809_v62 = vadd.f32 %v792_v52, %v757_v59  ;;  %v755_v21 = vadd.f32 %v739_v61, %v703_v11 }
  0xc2   : > { %v756_v18 = vadd.f32 %v741_v38, %v704_v42  ;;  %v843_v16 = vsel %vm830_vm5, %v840_v19, %v842_v63  ;;  %v845_v57 = vsel %vm830_vm5, %v842_v63, %v844_v34  ;;  %v935_v8 = vrot.slane %v2720_v41, 1 }
  0xc3   : > { %v2751_v4 = vmul.f32 %v878_v29, %v2492_v46  ;;  %v807_v30 = vadd.f32 %v791_v2, %v755_v21  ;;  %v982_v40 = vrot.slane %v2723_v0, 2  ;;  %v2755_v22 = vmul.f32 %v878_v29, %v2494_v47 }
  0xc4   : > { %v808_v37 = vadd.f32 %v793_v5, %v756_v18  ;;  %v1029_v24 = vrot.slane %v2740_v14, 3  ;;  %v2759_v3 = vmul.f32 %v878_v29, %v2496_v48  ;;  %v918_v19 = vmul.f32 %v873_v28, %v2486_v43 }
  0xc5   : > { %v965_v25 = vmul.f32 %v873_v28, %v2488_v44  ;;  %v2763_v58 = vadd.f32 %v843_v16, %v807_v30  ;;  %v1012_v50 = vmul.f32 %v873_v28, %v2490_v45  ;;  %v1059_v12 = vmul.f32 %v873_v28, %v2492_v46 }
  0xc6   : > { %v2765_v26 = vadd.f32 %v845_v57, %v808_v37  ;;  %v1076_v36 = vrot.slane %v2751_v4, 4  ;;  %v934_v20 = vrot.slane %v918_v19, 1  ;;  %v1106_v53 = vmul.f32 %v873_v28, %v2494_v47 }
  0xc7   : > { %v981_v52 = vrot.slane %v965_v25, 2  ;;  %v910_v9 = vmul.f32 %v873_v28, %v2498_v49  ;;  %v1028_v54 = vrot.slane %v1012_v50, 3  ;;  %v1075_v59 = vrot.slane %v1059_v12, 4 }
  0xc8   : > { %v1153_v1 = vmul.f32 %v873_v28, %v2496_v48  ;;  %v2776_v60 = vadd.f32 %v835_v56, %v2646_v27  ;;  %v2778_v15 = vadd.f32 %v844_v34, %v809_v62  ;;  %v936_v13 = vsel %vm570_vm0, %v934_v20, %v935_v8 }
  0xc9   : > { %v2783_v23 = vmul.f32 %v2769_v35, %v2486_v43  ;;  %v911_v61 = vmul.f32 %v878_v29, %v2498_v49  ;;  %v1123_v38 = vrot.slane %v2755_v22, 5  ;;  %v1170_v6 = vrot.slane %v2759_v3, 6 }
  0xca   : > { %v957_v51 = vadd.f32 %v936_v13, %v910_v9  ;;  %v983_v55 = vsel %vm622_vm1, %v981_v52, %v982_v40  ;;  %v1122_v27 = vrot.slane %v1106_v53, 5  ;;  %v2791_v34 = vmul.f32 %v2769_v35, %v2488_v44 }
  0xcb   : > { %v2795_v10 = vmul.f32 %v2769_v35, %v2490_v45  ;;  %v1030_v29 = vsel %vm674_vm2, %v1028_v54, %v1029_v24  ;;  %v1077_v0 = vsel %vm726_vm3, %v1075_v59, %v1076_v36  ;;  %v1169_v11 = vrot.slane %v1153_v1, 6 }
  0xcc   : > { %v1004_v41 = vadd.f32 %v983_v55, %v957_v51  ;;  %v939_v42 = vrot.slane %v2783_v23, 1  ;;  %v2806_v2 = vmul.f32 %v2769_v35, %v2492_v46  ;;  %v2810_v5 = vmul.f32 %v2769_v35, %v2494_v47  ;;  %v898_v51 = vpop.permute.xlu1 %897 }
  0xcd   : > { %v920_v32 = vmul.f32 %v883_v31, %v2486_v43  ;;  %v986_v63 = vrot.slane %v2791_v34, 2  ;;  %v1033_v62 = vrot.slane %v2795_v10, 3  ;;  %v2817_v21 = vmul.f32 %v2769_v35, %v2496_v48 }
  0xce   : > { %v1051_v56 = vadd.f32 %v1030_v29, %v1004_v41  ;;  %v967_v28 = vmul.f32 %v883_v31, %v2488_v44  ;;  %v1014_v16 = vmul.f32 %v883_v31, %v2490_v45  ;;  %v1061_v57 = vmul.f32 %v883_v31, %v2492_v46 }
  0xcf   : > { %v937_v18 = vrot.slane %v920_v32, 1  ;;  %v912_v37 = vmul.f32 %v883_v31, %v2498_v49  ;;  %v1108_v22 = vmul.f32 %v883_v31, %v2494_v47  ;;  %v1155_v19 = vmul.f32 %v883_v31, %v2496_v48 }
  0xd0   : > { %v1098_v30 = vadd.f32 %v1077_v0, %v1051_v56  ;;  %v984_v12 = vrot.slane %v967_v28, 2  ;;  %v1031_v20 = vrot.slane %v1014_v16, 3  ;;  %v1124_v52 = vsel %vm778_vm4, %v1122_v27, %v1123_v38 }
  0xd1   : > { %v938_v25 = vsel %vm570_vm0, %v935_v8, %v937_v18  ;;  %v940_v50 = vsel %vm570_vm0, %v937_v18, %v939_v42  ;;  %v1080_v53 = vrot.slane %v2806_v2, 4  ;;  %v1127_v59 = vrot.slane %v2810_v5, 5 }
  0xd2   : > { %v958_v9 = vadd.f32 %v938_v25, %v911_v61  ;;  %v959_v54 = vadd.f32 %v940_v50, %v912_v37  ;;  %v985_v1 = vsel %vm622_vm1, %v982_v40, %v984_v12  ;;  %v987_v8 = vsel %vm622_vm1, %v984_v12, %v986_v63 }
  0xd3   : > { %v1078_v13 = vrot.slane %v1061_v57, 4  ;;  %v1145_v31 = vadd.f32 %v1124_v52, %v1098_v30  ;;  %v1174_v55 = vrot.slane %v2817_v21, 6  ;;  %v1032_v61 = vsel %vm674_vm2, %v1029_v24, %v1031_v20 }
  0xd4   : > { %v1005_v41 = vadd.f32 %v985_v1, %v958_v9  ;;  %v1006_v29 = vadd.f32 %v987_v8, %v959_v54  ;;  %v1034_v27 = vsel %vm674_vm2, %v1031_v20, %v1033_v62  ;;  %v1125_v40 = vrot.slane %v1108_v22, 5 }
  0xd5   : > { %v1172_v0 = vrot.slane %v1155_v19, 6  ;;  %v913_v32 = vmul.f32 %v2769_v35, %v2498_v49  ;;  %v2846_v28 = vmul.f32 %v898_v51, %v2486_v43  ;;  %v1171_v14 = vsel %vm830_vm5, %v1169_v11, %v1170_v6  ;;  %v893_v35 = vpop.permute.xlu0 %892 }
  0xd6   : > { %v1052_v56 = vadd.f32 %v1032_v61, %v1005_v41  ;;  %v1053_v18 = vadd.f32 %v1034_v27, %v1006_v29  ;;  %v1079_v24 = vsel %vm726_vm3, %v1076_v36, %v1078_v13  ;;  %v1081_v16 = vsel %vm726_vm3, %v1078_v13, %v1080_v53 }
  0xd7   : > { %v2858_v57 = vmul.f32 %v898_v51, %v2488_v44  ;;  %v2860_v30 = vadd.f32 %v1171_v14, %v1145_v31  ;;  %v1126_v19 = vsel %vm778_vm4, %v1123_v38, %v1125_v40  ;;  %v1128_v4 = vsel %vm778_vm4, %v1125_v40, %v1127_v59 }
  0xd8   : > { %v1099_v37 = vadd.f32 %v1079_v24, %v1052_v56  ;;  %v1100_v22 = vadd.f32 %v1081_v16, %v1053_v18  ;;  %v1173_v36 = vsel %vm830_vm5, %v1170_v6, %v1172_v0  ;;  %v1175_v11 = vsel %vm830_vm5, %v1172_v0, %v1174_v55 }
  0xd9   : > { %v2873_v25 = vmul.f32 %v898_v51, %v2490_v45  ;;  %v943_v20 = vrot.slane %v2846_v28, 1  ;;  %v922_v38 = vmul.f32 %v893_v35, %v2486_v43  ;;  %v990_v52 = vrot.slane %v2858_v57, 2 }
  0xda   : > { %v1146_v50 = vadd.f32 %v1126_v19, %v1099_v37  ;;  %v1147_v12 = vadd.f32 %v1128_v4, %v1100_v22  ;;  %v2879_v9 = vmul.f32 %v898_v51, %v2492_v46  ;;  %v2882_v3 = vmul.f32 %v898_v51, %v2494_v47 }
  0xdb   : > { %v2885_v6 = vmul.f32 %v898_v51, %v2496_v48  ;;  %v1037_v54 = vrot.slane %v2873_v25, 3  ;;  %v914_v1 = vmul.f32 %v893_v35, %v2498_v49  ;;  %v941_v8 = vrot.slane %v922_v38, 1 }
  0xdc   : > { %v969_v13 = vmul.f32 %v893_v35, %v2488_v44  ;;  %v2890_v31 = vadd.f32 %v1173_v36, %v1146_v50  ;;  %v1016_v41 = vmul.f32 %v893_v35, %v2490_v45  ;;  %v1063_v29 = vmul.f32 %v893_v35, %v2492_v46  ;;  %v908_v36 = vpop.permute.xlu1 %907 }
  0xdd   : > { %v1110_v61 = vmul.f32 %v893_v35, %v2494_v47  ;;  %v2895_v27 = vadd.f32 %v1175_v11, %v1147_v12  ;;  %v942_v40 = vsel %vm570_vm0, %v939_v42, %v941_v8  ;;  %v944_v0 = vsel %vm570_vm0, %v941_v8, %v943_v20 }
  0xde   : > { %v1157_v56 = vmul.f32 %v893_v35, %v2496_v48  ;;  %v960_v18 = vadd.f32 %v942_v40, %v913_v32  ;;  %v961_v14 = vadd.f32 %v944_v0, %v914_v1  ;;  %v988_v24 = vrot.slane %v969_v13, 2 }
  0xdf   : > { %v1035_v16 = vrot.slane %v1016_v41, 3  ;;  %v915_v22 = vmul.f32 %v898_v51, %v2498_v49  ;;  %v1084_v19 = vrot.slane %v2879_v9, 4  ;;  %v1131_v23 = vrot.slane %v2882_v3, 5 }
  0xe0   : > { %v989_v42 = vsel %vm622_vm1, %v986_v63, %v988_v24  ;;  %v991_v32 = vsel %vm622_vm1, %v988_v24, %v990_v52  ;;  %v1082_v35 = vrot.slane %v1063_v29, 4  ;;  %v1129_v4 = vrot.slane %v1110_v61, 5  ;;  %v903_v24 = vpop.permute.xlu0 %902 }
  0xe1   : > { %v1178_v51 = vrot.slane %v2885_v6, 6  ;;  %v1007_v50 = vadd.f32 %v989_v42, %v960_v18  ;;  %v1008_v12 = vadd.f32 %v991_v32, %v961_v14  ;;  %v1036_v34 = vsel %vm674_vm2, %v1033_v62, %v1035_v16 }
  0xe2   : > { %v1038_v63 = vsel %vm674_vm2, %v1035_v16, %v1037_v54  ;;  %v1176_v1 = vrot.slane %v1157_v56, 6  ;;  %v925_v41 = vmul.f32 %v908_v36, %v2486_v43  ;;  %v972_v29 = vmul.f32 %v908_v36, %v2488_v44 }
  0xe3   : > { %v1054_v8 = vadd.f32 %v1036_v34, %v1007_v50  ;;  %v1055_v13 = vadd.f32 %v1038_v63, %v1008_v12  ;;  %v1083_v61 = vsel %vm726_vm3, %v1080_v53, %v1082_v35  ;;  %v1085_v10 = vsel %vm726_vm3, %v1082_v35, %v1084_v19 }
  0xe4   : > { %v1130_v62 = vsel %vm778_vm4, %v1127_v59, %v1129_v4  ;;  %v917_v40 = vmul.f32 %v908_v36, %v2498_v49  ;;  %v947_v56 = vrot.slane %v925_v41, 1  ;;  %v1019_v18 = vmul.f32 %v908_v36, %v2490_v45 }
  0xe5   : > { %v1101_v0 = vadd.f32 %v1083_v61, %v1054_v8  ;;  %v1066_v14 = vmul.f32 %v908_v36, %v2492_v46  ;;  %v1102_v2 = vadd.f32 %v1085_v10, %v1055_v13  ;;  %v1132_v53 = vsel %vm778_vm4, %v1129_v4, %v1131_v23 }
  0xe6   : > { %v1177_v5 = vsel %vm830_vm5, %v1174_v55, %v1176_v1  ;;  %v1179_v59 = vsel %vm830_vm5, %v1176_v1, %v1178_v51  ;;  %v964_v16 = vadd.f32 %v947_v56, %v917_v40  ;;  %v994_v42 = vrot.slane %v972_v29, 2 }
  0xe7   : > { %v1113_v32 = vmul.f32 %v908_v36, %v2494_v47  ;;  %v1160_v35 = vmul.f32 %v908_v36, %v2496_v48  ;;  %v1148_v50 = vadd.f32 %v1130_v62, %v1101_v0  ;;  %v924_v12 = vmul.f32 %v903_v24, %v2486_v43 }
  0xe8   : > { %v971_v34 = vmul.f32 %v903_v24, %v2488_v44  ;;  %v1018_v4 = vmul.f32 %v903_v24, %v2490_v45  ;;  %v1011_v21 = vadd.f32 %v994_v42, %v964_v16  ;;  %v1041_v63 = vrot.slane %v1019_v18, 3 }
  0xe9   : > { %v1088_v55 = vrot.slane %v1066_v14, 4  ;;  %v1065_v8 = vmul.f32 %v903_v24, %v2492_v46  ;;  %v1149_v13 = vadd.f32 %v1132_v53, %v1102_v2  ;;  %v945_v1 = vrot.slane %v924_v12, 1 }
  0xea   : > { %v992_v41 = vrot.slane %v971_v34, 2  ;;  %v1112_v29 = vmul.f32 %v903_v24, %v2494_v47  ;;  %v1058_v61 = vadd.f32 %v1041_v63, %v1011_v21  ;;  %v1135_v10 = vrot.slane %v1113_v32, 5  ;;  %v1224_v34 = vpop.permute.xlu1 %1223 }
  0xeb   : > { %v916_v36 = vmul.f32 %v903_v24, %v2498_v49  ;;  %v1039_v62 = vrot.slane %v1018_v4, 3  ;;  %v2957_v40 = vadd.f32 %v1177_v5, %v1148_v50  ;;  %v1182_v0 = vrot.slane %v1160_v35, 6 }
  0xec   : > { %v946_v18 = vsel %vm570_vm0, %v943_v20, %v945_v1  ;;  %v948_v14 = vsel %vm570_vm0, %v945_v1, %v947_v56  ;;  %v1105_v16 = vadd.f32 %v1088_v55, %v1058_v61  ;;  %v1086_v12 = vrot.slane %v1065_v8, 4 }
  0xed   : > { %v962_v2 = vadd.f32 %v946_v18, %v915_v22  ;;  %v963_v53 = vadd.f32 %v948_v14, %v916_v36  ;;  %v2963_v38 = vadd.f32 %v1179_v59, %v1149_v13  ;;  %v993_v32 = vsel %vm622_vm1, %v990_v52, %v992_v41 }
  0xee   : > { %v995_v5 = vsel %vm622_vm1, %v992_v41, %v994_v42  ;;  %v1133_v35 = vrot.slane %v1112_v29, 5  ;;  %v1152_v50 = vadd.f32 %v1135_v10, %v1105_v16  ;;  %v1040_v20 = vsel %vm674_vm2, %v1037_v54, %v1039_v62 }
  0xef   : > { %v1009_v28 = vadd.f32 %v993_v32, %v962_v2  ;;  %v1010_v4 = vadd.f32 %v995_v5, %v963_v53  ;;  %v1042_v22 = vsel %vm674_vm2, %v1039_v62, %v1041_v63  ;;  %v1159_v56 = vmul.f32 %v903_v24, %v2496_v48 }
  0xf0   : > { %v2975_v59 = vmul.f32 %v1224_v34, %v2486_v43  ;;  %v2978_v57 = vmul.f32 %v1224_v34, %v2488_v44  ;;  %v1087_v21 = vsel %vm726_vm3, %v1084_v19, %v1086_v12  ;;  %v2984_v25 = vmul.f32 %v1224_v34, %v2490_v45  ;;  %v1219_v19 = vpop.permute.xlu0 %1218 }
  0xf1   : > { %v1056_v52 = vadd.f32 %v1040_v20, %v1009_v28  ;;  %v1057_v42 = vadd.f32 %v1042_v22, %v1010_v4  ;;  %v1089_v54 = vsel %vm726_vm3, %v1086_v12, %v1088_v55  ;;  %v1134_v24 = vsel %vm778_vm4, %v1131_v23, %v1133_v35  ;;  %v1234_v22 = vpop.permute.xlu1 %1233 }
  0xf2   : > { %v1180_v63 = vrot.slane %v1159_v56, 6  ;;  %v2991_v8 = vmul.f32 %v1224_v34, %v2492_v46  ;;  %v2993_v13 = vadd.f32 %v1182_v0, %v1152_v50  ;;  %v1136_v9 = vsel %vm778_vm4, %v1133_v35, %v1135_v10 }
  0xf3   : > { %v1103_v1 = vadd.f32 %v1087_v21, %v1056_v52  ;;  %v1104_v41 = vadd.f32 %v1089_v54, %v1057_v42  ;;  %v1281_v55 = vrot.slane %v2975_v59, 1  ;;  %v1328_v3 = vrot.slane %v2978_v57, 2 }
  0xf4   : > { %v1181_v29 = vsel %vm830_vm5, %v1178_v51, %v1180_v63  ;;  %v1375_v23 = vrot.slane %v2984_v25, 3  ;;  %v1183_v62 = vsel %vm830_vm5, %v1180_v63, %v1182_v0  ;;  %v3692_v18 = vrot.slane %v2991_v8, 4 }
  0xf5   : > { %v1150_v61 = vadd.f32 %v1134_v24, %v1103_v1  ;;  %v1151_v36 = vadd.f32 %v1136_v9, %v1104_v41  ;;  %v3005_v14 = vmul.f32 %v1224_v34, %v2494_v47  ;;  %v1264_v10 = vmul.f32 %v1219_v19, %v2486_v43 }
  0xf6   : > { %v1311_v6 = vmul.f32 %v1219_v19, %v2488_v44  ;;  %v1358_v51 = vmul.f32 %v1219_v19, %v2490_v45  ;;  %v3015_v53 = vmul.f32 %v1224_v34, %v2496_v48  ;;  %v1405_v0 = vmul.f32 %v1219_v19, %v2492_v46 }
  0xf7   : > { %v3010_v16 = vadd.f32 %v1181_v29, %v1150_v61  ;;  %v3012_v2 = vadd.f32 %v1183_v62, %v1151_v36  ;;  %v1256_v12 = vmul.f32 %v1219_v19, %v2498_v49  ;;  %v1280_v32 = vrot.slane %v1264_v10, 1 }
  0xf8   : > { %v1327_v5 = vrot.slane %v1311_v6, 2  ;;  %v1452_v35 = vmul.f32 %v1219_v19, %v2494_v47  ;;  %v1374_v4 = vrot.slane %v1358_v51, 3  ;;  %v1499_v20 = vmul.f32 %v1219_v19, %v2496_v48  ;;  %v1229_v6 = vpop.permute.xlu0 %1228 }
  0xf9   : > { %v3691_v56 = vrot.slane %v3005_v14, 5  ;;  %v1282_v52 = vsel %vm570_vm0, %v1280_v32, %v1281_v55  ;;  %v1421_v42 = vrot.slane %v1405_v0, 4  ;;  %v3690_v24 = vrot.slane %v3015_v53, 6 }
  0xfa   : > { %v1468_v21 = vrot.slane %v1452_v35, 5  ;;  %v1303_v63 = vadd.f32 %v1282_v52, %v1256_v12  ;;  %v1515_v1 = vrot.slane %v1499_v20, 6  ;;  %v1257_v9 = vmul.f32 %v1224_v34, %v2498_v49 }
  0xfb   : > { %v1329_v19 = vsel %vm622_vm1, %v1327_v5, %v1328_v3  ;;  %v3039_v29 = vmul.f32 %v1234_v22, %v2486_v43  ;;  %v1376_v62 = vsel %vm674_vm2, %v1374_v4, %v1375_v23  ;;  %v3047_v10 = vmul.f32 %v1234_v22, %v2488_v44 }
  0xfc   : > { %v1350_v36 = vadd.f32 %v1329_v19, %v1303_v63  ;;  %v1423_v34 = vsel %vm726_vm3, %v1421_v42, %v3692_v18  ;;  %v1470_v51 = vsel %vm778_vm4, %v1468_v21, %v3691_v56  ;;  %v3056_v0 = vmul.f32 %v1234_v22, %v2498_v49 }
  0xfd   : > { %v3059_v12 = vmul.f32 %v1234_v22, %v2490_v45  ;;  %v1517_v5 = vsel %vm830_vm5, %v1515_v1, %v3690_v24  ;;  %v3065_v35 = vmul.f32 %v1234_v22, %v2492_v46  ;;  %v3068_v4 = vmul.f32 %v1234_v22, %v2494_v47  ;;  %v1244_v24 = vpop.permute.xlu1 %1243 }
  0xfe   : > { %v1397_v32 = vadd.f32 %v1376_v62, %v1350_v36  ;;  %v1285_v20 = vrot.slane %v3039_v29, 1  ;;  %v1266_v52 = vmul.f32 %v1229_v6, %v2486_v43  ;;  %v1313_v42 = vmul.f32 %v1229_v6, %v2488_v44 }
  0xff   : > { %v1360_v21 = vmul.f32 %v1229_v6, %v2490_v45  ;;  %v1332_v19 = vrot.slane %v3047_v10, 2  ;;  %v3076_v36 = vmul.f32 %v1234_v22, %v2496_v48  ;;  %v1407_v1 = vmul.f32 %v1229_v6, %v2492_v46 }
 0x100   : > { %v1444_v63 = vadd.f32 %v1423_v34, %v1397_v32  ;;  %v1379_v62 = vrot.slane %v3059_v12, 3  ;;  %v1283_v28 = vrot.slane %v1266_v52, 1  ;;  %v1330_v50 = vrot.slane %v1313_v42, 2 }
 0x101   : > { %v1454_v61 = vmul.f32 %v1229_v6, %v2494_v47  ;;  %v1258_v11 = vmul.f32 %v1229_v6, %v2498_v49  ;;  %v1501_v34 = vmul.f32 %v1229_v6, %v2496_v48  ;;  %v1377_v42 = vrot.slane %v1360_v21, 3 }
 0x102   : > { %v1491_v41 = vadd.f32 %v1470_v51, %v1444_v63  ;;  %v1284_v22 = vsel %vm570_vm0, %v1281_v55, %v1283_v28  ;;  %v1286_v52 = vsel %vm570_vm0, %v1283_v28, %v1285_v20  ;;  %v3694_v51 = vrot.slane %v3076_v36, 6 }
 0x103   : > { %v1304_v63 = vadd.f32 %v1284_v22, %v1257_v9  ;;  %v1305_v56 = vadd.f32 %v1286_v52, %v1258_v11  ;;  %v1424_v37 = vrot.slane %v1407_v1, 4  ;;  %v1331_v6 = vsel %vm622_vm1, %v1328_v3, %v1330_v50 }
 0x104   : > { %v1538_v54 = vadd.f32 %v1517_v5, %v1491_v41  ;;  %v1333_v59 = vsel %vm622_vm1, %v1330_v50, %v1332_v19  ;;  %v1471_v55 = vrot.slane %v1454_v61, 5  ;;  %v1518_v28 = vrot.slane %v1501_v34, 6  ;;  %v1239_v5 = vpop.permute.xlu0 %1238 }
 0x105   : > { %v1351_v32 = vadd.f32 %v1331_v6, %v1304_v63  ;;  %v1352_v18 = vadd.f32 %v1333_v59, %v1305_v56  ;;  %v3099_v21 = vmul.f32 %v1244_v24, %v2498_v49  ;;  %v1378_v11 = vsel %vm674_vm2, %v1375_v23, %v1377_v42 }
 0x106   : > { %v1380_v57 = vsel %vm674_vm2, %v1377_v42, %v1379_v62  ;;  %v3108_v3 = vmul.f32 %v1244_v24, %v2486_v43  ;;  %v3111_v50 = vmul.f32 %v1244_v24, %v2488_v44  ;;  %v3697_v9 = vrot.slane %v2991_v8, 4 }
 0x107   : > { %v1398_v41 = vadd.f32 %v1378_v11, %v1351_v32  ;;  %v1399_v56 = vadd.f32 %v1380_v57, %v1352_v18  ;;  %v3698_v25 = vrot.slane %v3065_v35, 4  ;;  %v3699_v1 = vmax.f32 %v2743_v39, %v2860_v30 }
 0x108   : > { %v1425_v61 = vsel %vm726_vm3, %v3697_v9, %v1424_v37  ;;  %v3700_v22 = vrot.slane %v3005_v14, 5  ;;  %v3701_v18 = vrot.slane %v3068_v4, 5  ;;  %v3131_v32 = vmul.f32 %v1244_v24, %v2490_v45 }
 0x109   : > { %v1427_v23 = vsel %vm726_vm3, %v1424_v37, %v3698_v25  ;;  %v3122_v34 = vmax.f32 %v3699_v1, %v1538_v54  ;;  %v1445_v42 = vadd.f32 %v1425_v61, %v1398_v41  ;;  %v3702_v37 = vrot.slane %v3015_v53, 6 }
 0x10a   : > { %v1472_v52 = vsel %vm778_vm4, %v3700_v22, %v1471_v55  ;;  %v1474_v8 = vsel %vm778_vm4, %v1471_v55, %v3701_v18  ;;  %v1446_v63 = vadd.f32 %v1427_v23, %v1399_v56  ;;  %v1521_v39 = vsel %vm830_vm5, %v1518_v28, %v3694_v51 }
 0x10b   : > { %v1519_v6 = vsel %vm830_vm5, %v3702_v37, %v1518_v28  ;;  %v3693_v30 = vrot.slane %v3108_v3, 1  ;;  %v1336_v14 = vrot.slane %v3111_v50, 2  ;;  %v3142_v54 = vmul.f32 %v1244_v24, %v2492_v46 }
 0x10c   : > { %v1268_v59 = vmul.f32 %v1239_v5, %v2486_v43  ;;  %v3146_v55 = vmul.f32 %v1244_v24, %v2494_v47  ;;  %v3149_v53 = vmul.f32 %v1244_v24, %v2496_v48  ;;  %v1315_v11 = vmul.f32 %v1239_v5, %v2488_v44 }
 0x10d   : > { %v1362_v57 = vmul.f32 %v1239_v5, %v2490_v45  ;;  %v1492_v28 = vadd.f32 %v1472_v52, %v1445_v42  ;;  %v1383_v41 = vrot.slane %v3131_v32, 3  ;;  %v1409_v9 = vmul.f32 %v1239_v5, %v2492_v46 }
 0x10e   : > { %v1287_v56 = vrot.slane %v1268_v59, 1  ;;  %v1493_v61 = vadd.f32 %v1474_v8, %v1446_v63  ;;  %v1260_v25 = vmul.f32 %v1239_v5, %v2498_v49  ;;  %v1334_v23 = vrot.slane %v1315_v11, 2 }
 0x10f   : > { %v1456_v1 = vmul.f32 %v1239_v5, %v2494_v47  ;;  %v1381_v52 = vrot.slane %v1362_v57, 3  ;;  %v1503_v18 = vmul.f32 %v1239_v5, %v2496_v48  ;;  %v1430_v42 = vrot.slane %v3142_v54, 4  ;;  %v1254_v57 = vpop.permute.xlu1 %1253 }
 0x110   : > { %v1288_v24 = vsel %vm570_vm0, %v1285_v20, %v1287_v56  ;;  %v1290_v22 = vsel %vm570_vm0, %v1287_v56, %v3693_v30  ;;  %v1477_v8 = vrot.slane %v3146_v55, 5  ;;  %v1539_v59 = vadd.f32 %v1519_v6, %v1492_v28 }
 0x111   : > { %v1306_v63 = vadd.f32 %v1288_v24, %v3056_v0  ;;  %v1307_v37 = vadd.f32 %v1290_v22, %v1260_v25  ;;  %v1335_v29 = vsel %vm622_vm1, %v1332_v19, %v1334_v23  ;;  %v1337_v20 = vsel %vm622_vm1, %v1334_v23, %v1336_v14 }
 0x112   : > { %v1428_v11 = vrot.slane %v1409_v9, 4  ;;  %v1540_v56 = vadd.f32 %v1521_v39, %v1493_v61  ;;  %v1524_v5 = vrot.slane %v3149_v53, 6  ;;  %v1382_v0 = vsel %vm674_vm2, %v1379_v62, %v1381_v52 }
 0x113   : > { %v1353_v30 = vadd.f32 %v1335_v29, %v1306_v63  ;;  %v1354_v51 = vadd.f32 %v1337_v20, %v1307_v37  ;;  %v1384_v10 = vsel %vm674_vm2, %v1381_v52, %v1383_v41  ;;  %v1475_v19 = vrot.slane %v1456_v1, 5 }
 0x114   : > { %v1522_v6 = vrot.slane %v1503_v18, 6  ;;  %v1271_v9 = vmul.f32 %v1254_v57, %v2486_v43  ;;  %v1318_v39 = vmul.f32 %v1254_v57, %v2488_v44  ;;  %v3703_v61 = vmax.f32 %v2776_v60, %v2890_v31  ;;  %v1249_v18 = vpop.permute.xlu0 %1248 }
 0x115   : > { %v1400_v28 = vadd.f32 %v1382_v0, %v1353_v30  ;;  %v1401_v25 = vadd.f32 %v1384_v10, %v1354_v51  ;;  %v3704_v12 = vrot.slane %v3065_v35, 4  ;;  %v1431_v1 = vsel %vm726_vm3, %v1428_v11, %v1430_v42 }
 0x116   : > { %v3185_v23 = vmax.f32 %v3703_v61, %v1539_v59  ;;  %v1365_v30 = vmul.f32 %v1254_v57, %v2490_v45  ;;  %v1263_v24 = vmul.f32 %v1254_v57, %v2498_v49  ;;  %v1293_v22 = vrot.slane %v1271_v9, 1 }
 0x117   : > { %v1429_v62 = vsel %vm726_vm3, %v3704_v12, %v1428_v11  ;;  %v1412_v52 = vmul.f32 %v1254_v57, %v2492_v46  ;;  %v1448_v60 = vadd.f32 %v1431_v1, %v1401_v25  ;;  %v3705_v31 = vrot.slane %v3068_v4, 5 }
 0x118   : > { %v1447_v51 = vadd.f32 %v1429_v62, %v1400_v28  ;;  %v1478_v63 = vsel %vm778_vm4, %v1475_v19, %v1477_v8  ;;  %v3706_v37 = vrot.slane %v3076_v36, 6  ;;  %v1310_v29 = vadd.f32 %v1293_v22, %v1263_v24  ;;  %v1565_v54 = vpop.permute.xlu0 %1564 }
 0x119   : > { %v1476_v35 = vsel %vm778_vm4, %v3705_v31, %v1475_v19  ;;  %v1340_v20 = vrot.slane %v1318_v39, 2  ;;  %v1459_v11 = vmul.f32 %v1254_v57, %v2494_v47  ;;  %v1506_v0 = vmul.f32 %v1254_v57, %v2496_v48 }
 0x11a   : > { %v1523_v59 = vsel %vm830_vm5, %v3706_v37, %v1522_v6  ;;  %v1525_v4 = vsel %vm830_vm5, %v1522_v6, %v1524_v5  ;;  %v1387_v10 = vrot.slane %v1365_v30, 3  ;;  %v1270_v28 = vmul.f32 %v1249_v18, %v2486_v43 }
 0x11b   : > { %v1317_v25 = vmul.f32 %v1249_v18, %v2488_v44  ;;  %v1494_v19 = vadd.f32 %v1476_v35, %v1447_v51  ;;  %v1357_v9 = vadd.f32 %v1340_v20, %v1310_v29  ;;  %v1434_v36 = vrot.slane %v1412_v52, 4 }
 0x11c   : > { %v1364_v61 = vmul.f32 %v1249_v18, %v2490_v45  ;;  %v1495_v12 = vadd.f32 %v1478_v63, %v1448_v60  ;;  %v1291_v39 = vrot.slane %v1270_v28, 1  ;;  %v1411_v1 = vmul.f32 %v1249_v18, %v2492_v46 }
 0x11d   : > { %v1338_v62 = vrot.slane %v1317_v25, 2  ;;  %v1404_v57 = vadd.f32 %v1387_v10, %v1357_v9  ;;  %v1481_v24 = vrot.slane %v1459_v11, 5  ;;  %v1528_v31 = vrot.slane %v1506_v0, 6 }
 0x11e   : > { %v1262_v6 = vmul.f32 %v1249_v18, %v2498_v49  ;;  %v3707_v30 = vrot.slane %v3108_v3, 1  ;;  %v1294_v51 = vsel %vm570_vm0, %v1291_v39, %v1293_v22  ;;  %v1385_v35 = vrot.slane %v1364_v61, 3 }
 0x11f   : > { %v1458_v52 = vmul.f32 %v1249_v18, %v2494_v47  ;;  %v1541_v29 = vadd.f32 %v1523_v59, %v1494_v19  ;;  %v1451_v60 = vadd.f32 %v1434_v36, %v1404_v57  ;;  %v1339_v11 = vsel %vm622_vm1, %v1336_v14, %v1338_v62 }
 0x120   : > { %v1292_v37 = vsel %vm570_vm0, %v3707_v30, %v1291_v39  ;;  %v1309_v28 = vadd.f32 %v1294_v51, %v1262_v6  ;;  %v1341_v0 = vsel %vm622_vm1, %v1338_v62, %v1340_v20  ;;  %v1432_v25 = vrot.slane %v1411_v1, 4  ;;  %v1570_v39 = vpop.permute.xlu1 %1569 }
 0x121   : > { %v1308_v63 = vadd.f32 %v1292_v37, %v3099_v21  ;;  %v1505_v3 = vmul.f32 %v1249_v18, %v2496_v48  ;;  %v1542_v9 = vadd.f32 %v1525_v4, %v1495_v12  ;;  %v1498_v30 = vadd.f32 %v1481_v24, %v1451_v60 }
 0x122   : > { %v1356_v61 = vadd.f32 %v1341_v0, %v1309_v28  ;;  %v3708_v59 = vmax.f32 %v2615_v33, %v2895_v27  ;;  %v1386_v21 = vsel %vm674_vm2, %v1383_v41, %v1385_v35  ;;  %v1388_v50 = vsel %vm674_vm2, %v1385_v35, %v1387_v10 }
 0x123   : > { %v1355_v22 = vadd.f32 %v1339_v11, %v1308_v63  ;;  %v1479_v14 = vrot.slane %v1458_v52, 5  ;;  %v1545_v20 = vadd.f32 %v1528_v31, %v1498_v30  ;;  %v1526_v4 = vrot.slane %v1505_v3, 6 }
 0x124   : > { %v3229_v19 = vmax.f32 %v3708_v59, %v1540_v56  ;;  %v1403_v18 = vadd.f32 %v1388_v50, %v1356_v61  ;;  %v3709_v12 = vmax.f32 %v2696_v7, %v2957_v40  ;;  %v1433_v33 = vsel %vm726_vm3, %v1430_v42, %v1432_v25  ;;  %v1580_v3 = vpop.permute.xlu1 %1579 }
 0x125   : > { %v1402_v62 = vadd.f32 %v1386_v21, %v1355_v22  ;;  %v3244_v27 = vmul.f32 %v1570_v39, %v2486_v43  ;;  %v3247_v32 = vmul.f32 %v1570_v39, %v2488_v44  ;;  %v3710_v41 = vmax.f32 %v2698_v17, %v2963_v38 }
 0x126   : > { %v3238_v1 = vmax.f32 %v3709_v12, %v1541_v29  ;;  %v3255_v7 = vmul.f32 %v1570_v39, %v2498_v49  ;;  %v3258_v40 = vmul.f32 %v1570_v39, %v2490_v45  ;;  %v1435_v42 = vsel %vm726_vm3, %v1432_v25, %v1434_v36 }
 0x127   : > { %v3252_v56 = vmax.f32 %v3710_v41, %v1542_v9  ;;  %v1449_v10 = vadd.f32 %v1433_v33, %v1402_v62  ;;  %v1480_v57 = vsel %vm778_vm4, %v1477_v8, %v1479_v14  ;;  %v1482_v6 = vsel %vm778_vm4, %v1479_v14, %v1481_v24  ;;  %v1575_v41 = vpop.permute.xlu0 %1574 }
 0x128   : > { %v3266_v17 = vmul.f32 %v1570_v39, %v2492_v46  ;;  %v3711_v38 = vmax.f32 %v2778_v15, %v2993_v13  ;;  %v1450_v51 = vadd.f32 %v1435_v42, %v1403_v18  ;;  %v3276_v35 = vsel %vm830_vm5, %v1524_v5, %v1526_v4 }
 0x129   : > { %v3279_v55 = vmul.f32 %v1570_v39, %v2494_v47  ;;  %v3282_v8 = vsel %vm830_vm5, %v1526_v4, %v1528_v31  ;;  %v1627_v36 = vrot.slane %v3244_v27, 1  ;;  %v1674_v24 = vrot.slane %v3247_v32, 2 }
 0x12a   : > { %v3271_v37 = vmax.f32 %v3711_v38, %v1545_v20  ;;  %v1610_v15 = vmul.f32 %v1565_v54, %v2486_v43  ;;  %v3287_v13 = vadd.f32 %v1480_v57, %v1449_v10  ;;  %v1721_v52 = vrot.slane %v3258_v40, 3 }
 0x12b   : > { %v3291_v53 = vmul.f32 %v1570_v39, %v2496_v48  ;;  %v1657_v5 = vmul.f32 %v1565_v54, %v2488_v44  ;;  %v1768_v29 = vrot.slane %v3266_v17, 4  ;;  %v1704_v31 = vmul.f32 %v1565_v54, %v2490_v45 }
 0x12c   : > { %v1626_v60 = vrot.slane %v1610_v15, 1  ;;  %v1751_v63 = vmul.f32 %v1565_v54, %v2492_v46  ;;  %v3696_v28 = vrot.slane %v3279_v55, 5  ;;  %v1602_v11 = vmul.f32 %v1565_v54, %v2498_v49 }
 0x12d   : > { %v1673_v0 = vrot.slane %v1657_v5, 2  ;;  %v1798_v25 = vmul.f32 %v1565_v54, %v2494_v47  ;;  %v1720_v30 = vrot.slane %v1704_v31, 3  ;;  %v1845_v61 = vmul.f32 %v1565_v54, %v2496_v48 }
 0x12e   : > { %v1628_v9 = vsel %vm570_vm0, %v1626_v60, %v1627_v36  ;;  %v1767_v22 = vrot.slane %v1751_v63, 4  ;;  %v3302_v39 = vadd.f32 %v1482_v6, %v1450_v51  ;;  %v3695_v59 = vrot.slane %v3291_v53, 6  ;;  %v3359_v60 = vpop.permute.xlu1 %1589 }
 0x12f   : > { %v1649_v21 = vadd.f32 %v1628_v9, %v1602_v11  ;;  %v1814_v50 = vrot.slane %v1798_v25, 5  ;;  %v1675_v14 = vsel %vm622_vm1, %v1673_v0, %v1674_v24  ;;  %v1861_v20 = vrot.slane %v1845_v61, 6 }
 0x130   : > { %v3309_v62 = vmul.f32 %v1580_v3, %v2498_v49  ;;  %v3312_v18 = vmul.f32 %v1580_v3, %v2486_v43  ;;  %v1722_v12 = vsel %vm674_vm2, %v1720_v30, %v1721_v52  ;;  %v3318_v33 = vmul.f32 %v1580_v3, %v2488_v44 }
 0x131   : > { %v1696_v4 = vadd.f32 %v1675_v14, %v1649_v21  ;;  %v3321_v27 = vmul.f32 %v1580_v3, %v2490_v45  ;;  %v1769_v10 = vsel %vm726_vm3, %v1767_v22, %v1768_v29  ;;  %v1816_v54 = vsel %vm778_vm4, %v1814_v50, %v3696_v28 }
 0x132   : > { %v3330_v42 = vmul.f32 %v1580_v3, %v2492_v46  ;;  %v3333_v57 = vmul.f32 %v1580_v3, %v2494_v47  ;;  %v1863_v38 = vsel %vm830_vm5, %v1861_v20, %v3695_v59  ;;  %v1631_v51 = vrot.slane %v3312_v18, 1 }
 0x133   : > { %v1743_v6 = vadd.f32 %v1722_v12, %v1696_v4  ;;  %v1678_v15 = vrot.slane %v3318_v33, 2  ;;  %v1725_v5 = vrot.slane %v3321_v27, 3  ;;  %v3343_v31 = vmul.f32 %v1580_v3, %v2496_v48 }
 0x134   : > { %v1612_v63 = vmul.f32 %v1575_v41, %v2486_v43  ;;  %v1659_v25 = vmul.f32 %v1575_v41, %v2488_v44  ;;  %v1706_v9 = vmul.f32 %v1575_v41, %v2490_v45  ;;  %v1604_v30 = vmul.f32 %v1575_v41, %v2498_v49 }
 0x135   : > { %v1790_v11 = vadd.f32 %v1769_v10, %v1743_v6  ;;  %v1753_v61 = vmul.f32 %v1575_v41, %v2492_v46  ;;  %v1800_v21 = vmul.f32 %v1575_v41, %v2494_v47  ;;  %v1847_v20 = vmul.f32 %v1575_v41, %v2496_v48  ;;  %v3364_v41 = vld [vmem:[%s3686_s5] ss:$0 sm:$0xff] }
 0x136   : > { %v1629_v22 = vrot.slane %v1612_v63, 1  ;;  %v1676_v3 = vrot.slane %v1659_v25, 2  ;;  %v1723_v14 = vrot.slane %v1706_v9, 3  ;;  %v1866_v63 = vrot.slane %v3343_v31, 6 }
 0x137   : > { %v1837_v50 = vadd.f32 %v1816_v54, %v1790_v11  ;;  %v1770_v10 = vrot.slane %v1753_v61, 4  ;;  %v1817_v6 = vrot.slane %v1800_v21, 5  ;;  %v3713_v40 = vrot.slane %v3279_v55, 5 }
 0x138   : > { %v1630_v4 = vsel %vm570_vm0, %v1627_v36, %v1629_v22  ;;  %v1632_v12 = vsel %vm570_vm0, %v1629_v22, %v1631_v51  ;;  %v1677_v36 = vsel %vm622_vm1, %v1674_v24, %v1676_v3  ;;  %v1679_v54 = vsel %vm622_vm1, %v1676_v3, %v1678_v15 }
 0x139   : > { %v1884_v59 = vadd.f32 %v1863_v38, %v1837_v50  ;;  %v1650_v0 = vadd.f32 %v1630_v4, %v3255_v7  ;;  %v1651_v28 = vadd.f32 %v1632_v12, %v1604_v30  ;;  %v1724_v7 = vsel %vm674_vm2, %v1721_v52, %v1723_v14 }
 0x13a   : > { %v1726_v38 = vsel %vm674_vm2, %v1723_v14, %v1725_v5  ;;  %v1771_v32 = vsel %vm726_vm3, %v1768_v29, %v1770_v10  ;;  %v3712_v24 = vrot.slane %v3330_v42, 4  ;;  %v1818_v52 = vsel %vm778_vm4, %v3713_v40, %v1817_v6  ;;  %v1585_v14 = vpop.permute.xlu0 %1584 }
 0x13b   : > { %v1892_v11 = vmax.f32 %v3122_v34, %v1884_v59  ;;  %v1697_v25 = vadd.f32 %v1677_v36, %v1650_v0  ;;  %v1698_v9 = vadd.f32 %v1679_v54, %v1651_v28  ;;  %v1864_v22 = vrot.slane %v1847_v20, 6 }
 0x13c   : > { %v1773_v30 = vsel %vm726_vm3, %v1770_v10, %v3712_v24  ;;  %v3390_v61 = vmul.f32 %v3359_v60, %v2486_v43  ;;  %v3395_v17 = vmul.f32 %v3359_v60, %v2488_v44  ;;  %v3714_v29 = vrot.slane %v3333_v57, 5 }
 0x13d   : > { %v1907_v34 = vadd.f32 %v3364_v41, %v1892_v11  ;;  %v1744_v28 = vadd.f32 %v1724_v7, %v1697_v25  ;;  %v1745_v59 = vadd.f32 %v1726_v38, %v1698_v9  ;;  %v3715_v55 = vrot.slane %v3291_v53, 6 }
 0x13e   : > { %v1820_v0 = vsel %vm778_vm4, %v1817_v6, %v3714_v29  ;;  %v1867_v50 = vsel %vm830_vm5, %v1864_v22, %v1866_v63  ;;  %v3408_v3 = vmul.f32 %v3359_v60, %v2490_v45  ;;  %v1635_v10 = vrot.slane %v3390_v61, 1  ;;  %v1595_v31 = vpop.permute.xlu0 %1594 }
 0x13f   : > { %v1865_v21 = vsel %vm830_vm5, %v3715_v55, %v1864_v22  ;;  %v1915_v20 = vmax.f32 %v1907_v34, 0.0  ;;  %v1791_v4 = vadd.f32 %v1771_v32, %v1744_v28  ;;  %v1792_v12 = vadd.f32 %v1773_v30, %v1745_v59 }
 0x140   : > { %v1682_v6 = vrot.slane %v3395_v17, 2  ;;  %v1729_v53 = vrot.slane %v3408_v3, 3  ;;  %v3415_v36 = vmul.f32 %v3359_v60, %v2492_v46  ;;  %v3419_v54 = vmul.f32 %v3359_v60, %v2494_v47 }
 0x141   : > { %1924 = vst.msk [vmem:[#allocation2] sm:$0xff] %vm1923_vm6, %v1915_v20  ;;  %v1838_v7 = vadd.f32 %v1818_v52, %v1791_v4  ;;  %v1839_v38 = vadd.f32 %v1820_v0, %v1792_v12  ;;  %v3424_v11 = vmul.f32 %v3359_v60, %v2496_v48  ;;  %v1614_v25 = vmul.f32 %v1585_v14, %v2486_v43 }
 0x142   : > { %v1776_v9 = vrot.slane %v3415_v36, 4  ;;  %v1823_v32 = vrot.slane %v3419_v54, 5  ;;  %v1606_v24 = vmul.f32 %v1585_v14, %v2498_v49  ;;  %v1661_v30 = vmul.f32 %v1585_v14, %v2488_v44 }
 0x143   : > { %v1885_v40 = vadd.f32 %v1865_v21, %v1838_v7  ;;  %v1886_v22 = vadd.f32 %v1867_v50, %v1839_v38  ;;  %v1633_v34 = vrot.slane %v1614_v25, 1  ;;  %v1708_v52 = vmul.f32 %v1585_v14, %v2490_v45 }
 0x144   : > { %v1680_v28 = vrot.slane %v1661_v30, 2  ;;  %v1755_v59 = vmul.f32 %v1585_v14, %v2492_v46  ;;  %v1802_v29 = vmul.f32 %v1585_v14, %v2494_v47  ;;  %v1849_v0 = vmul.f32 %v1585_v14, %v2496_v48 }
 0x145   : > { %v1893_v55 = vmax.f32 %v3185_v23, %v1885_v40  ;;  %v1894_v20 = vmax.f32 %v3229_v19, %v1886_v22  ;;  %v1634_v4 = vsel %vm570_vm0, %v1631_v51, %v1633_v34  ;;  %v1636_v21 = vsel %vm570_vm0, %v1633_v34, %v1635_v10 }
 0x146   : > { %v1652_v50 = vadd.f32 %v1634_v4, %v3309_v62  ;;  %v1653_v12 = vadd.f32 %v1636_v21, %v1606_v24  ;;  %v1681_v7 = vsel %vm622_vm1, %v1678_v15, %v1680_v28  ;;  %v1683_v23 = vsel %vm622_vm1, %v1680_v28, %v1682_v6 }
 0x147   : > { %v1908_v19 = vadd.f32 %v3364_v41, %v1893_v55  ;;  %v1909_v18 = vadd.f32 %v3364_v41, %v1894_v20  ;;  %v1727_v51 = vrot.slane %v1708_v52, 3  ;;  %v1774_v14 = vrot.slane %v1755_v59, 4  ;;  %v1600_v59 = vpop.permute.xlu1 %1599 }
 0x148   : > { %v1699_v38 = vadd.f32 %v1681_v7, %v1652_v50  ;;  %v1700_v25 = vadd.f32 %v1683_v23, %v1653_v12  ;;  %v1821_v30 = vrot.slane %v1802_v29, 5  ;;  %v1868_v40 = vrot.slane %v1849_v0, 6 }
 0x149   : > { %v1916_v62 = vmax.f32 %v1908_v19, 0.0  ;;  %v1917_v24 = vmax.f32 %v1909_v18, 0.0  ;;  %v1728_v33 = vsel %vm674_vm2, %v1725_v5, %v1727_v51  ;;  %v1730_v15 = vsel %vm674_vm2, %v1727_v51, %v1729_v53 }
 0x14a   : > { %v3460_v22 = vadd.f32 %v3276_v35, %v3287_v13  ;;  %v1607_v34 = vmul.f32 %v3359_v60, %v2498_v49  ;;  %v1746_v52 = vadd.f32 %v1728_v33, %v1699_v38  ;;  %v1747_v28 = vadd.f32 %v1730_v15, %v1700_v25 }
 0x14b   : > { %1925 = vst.msk [vmem:[#allocation2 + $0x8] sm:$0xff] %vm1923_vm6, %v1916_v62  ;;  %1926 = vst.msk [vmem:[#allocation2 + $0x10] sm:$0xff] %vm1923_vm6, %v1917_v24  ;;  %v1870_v27 = vrot.slane %v3424_v11, 6  ;;  %v3716_v5 = vrot.slane %v3330_v42, 4  ;;  %v1777_v35 = vsel %vm726_vm3, %v1774_v14, %v1776_v9  ;;  %v3717_v13 = vrot.slane %v3333_v57, 5 }
 0x14c   : > { %v1794_v55 = vadd.f32 %v1777_v35, %v1747_v28  ;;  %v1824_v20 = vsel %vm778_vm4, %v1821_v30, %v1823_v32  ;;  %v1869_v42 = vsel %vm830_vm5, %v1866_v63, %v1868_v40  ;;  %v1617_v4 = vmul.f32 %v1600_v59, %v2486_v43 }
 0x14d   : > { %v1775_v29 = vsel %vm726_vm3, %v3716_v5, %v1774_v14  ;;  %v1822_v60 = vsel %vm778_vm4, %v3717_v13, %v1821_v30  ;;  %v1664_v21 = vmul.f32 %v1600_v59, %v2488_v44  ;;  %v1711_v50 = vmul.f32 %v1600_v59, %v2490_v45 }
 0x14e   : > { %v1793_v0 = vadd.f32 %v1775_v29, %v1746_v52  ;;  %v3486_v57 = vmul.f32 %v1600_v59, %v2492_v46  ;;  %v1841_v7 = vadd.f32 %v1824_v20, %v1794_v55  ;;  %v3489_v23 = vmul.f32 %v1600_v59, %v2494_v47 }
 0x14f   : > { %v3492_v19 = vmul.f32 %v1600_v59, %v2496_v48  ;;  %v1871_v63 = vsel %vm830_vm5, %v1868_v40, %v1870_v27  ;;  %v1609_v18 = vmul.f32 %v1600_v59, %v2498_v49  ;;  %v1639_v51 = vrot.slane %v1617_v4, 1 }
 0x150   : > { %v1840_v12 = vadd.f32 %v1822_v60, %v1793_v0  ;;  %v1686_v14 = vrot.slane %v1664_v21, 2  ;;  %v1888_v25 = vadd.f32 %v1871_v63, %v1841_v7  ;;  %v1733_v30 = vrot.slane %v1711_v50, 3 }
 0x151   : > { %v1780_v62 = vrot.slane %v3486_v57, 4  ;;  %v1656_v24 = vadd.f32 %v1639_v51, %v1609_v18  ;;  %v1827_v33 = vrot.slane %v3489_v23, 5  ;;  %v1616_v15 = vmul.f32 %v1595_v31, %v2486_v43 }
 0x152   : > { %v1887_v38 = vadd.f32 %v1869_v42, %v1840_v12  ;;  %v1663_v52 = vmul.f32 %v1595_v31, %v2488_v44  ;;  %v1896_v40 = vmax.f32 %v3252_v56, %v1888_v25  ;;  %v1874_v59 = vrot.slane %v3492_v19, 6  ;;  %v1933_v50 = vld [vmem:[#allocation2] ss:$3 sm:$0xff]  ;;  %v1939_v57 = vld [vmem:[#allocation2 + $0x1] ss:$3 sm:$0xff] }
 0x153   : > { %v1710_v5 = vmul.f32 %v1595_v31, %v2490_v45  ;;  %v1703_v29 = vadd.f32 %v1686_v14, %v1656_v24  ;;  %v1637_v35 = vrot.slane %v1616_v15, 1  ;;  %v1757_v60 = vmul.f32 %v1595_v31, %v2492_v46  ;;  %v1948_v24 = vld [vmem:[#allocation2 + $0x2] ss:$3 sm:$0xff] }
 0x154   : > { %v1895_v28 = vmax.f32 %v3238_v1, %v1887_v38  ;;  %v1684_v13 = vrot.slane %v1663_v52, 2  ;;  %v1911_v55 = vadd.f32 %v3364_v41, %v1896_v40  ;;  %v1608_v43 = vmul.f32 %v1595_v31, %v2498_v49 }
 0x155   : > { %v1731_v44 = vrot.slane %v1710_v5, 3  ;;  %v1750_v20 = vadd.f32 %v1733_v30, %v1703_v29  ;;  %v1638_v1 = vsel %vm570_vm0, %v1635_v10, %v1637_v35  ;;  %v1640_v56 = vsel %vm570_vm0, %v1637_v35, %v1639_v51  ;;  %v2011_v51 = vld [vmem:[%s3687_s6] sm:$0xff] }
 0x156   : > { %v1910_v0 = vadd.f32 %v3364_v41, %v1895_v28  ;;  %v1804_v45 = vmul.f32 %v1595_v31, %v2494_v47  ;;  %v1919_v4 = vmax.f32 %v1911_v55, 0.0  ;;  %v1654_v21 = vadd.f32 %v1638_v1, %v1607_v34 }
 0x157   : > { %v1655_v46 = vadd.f32 %v1640_v56, %v1608_v43  ;;  %v1797_v12 = vadd.f32 %v1780_v62, %v1750_v20  ;;  %v1685_v49 = vsel %vm622_vm1, %v1682_v6, %v1684_v13  ;;  %v1687_v7 = vsel %vm622_vm1, %v1684_v13, %v1686_v14  ;;  %v2012_v14 = vld [vmem:[%s3687_s6 + $0x8] sm:$0xff] }
 0x158   : > { %v1918_v42 = vmax.f32 %v1910_v0, 0.0  ;;  %v1778_v61 = vrot.slane %v1757_v60, 4  ;;  %1928 = vst.msk [vmem:[#allocation2 + $0x20] sm:$0xff] %vm1923_vm6, %v1919_v4  ;;  %v1701_v10 = vadd.f32 %v1685_v49, %v1654_v21  ;;  %v1732_v34 = vsel %vm674_vm2, %v1729_v53, %v1731_v44  ;;  %v2020_v4 = vld [vmem:[%s3687_s6 + $0x48] sm:$0xff]  ;;  %v2021_v21 = vld [vmem:[%s3687_s6 + $0x50] sm:$0xff] }
 0x159   : > { %v1702_v47 = vadd.f32 %v1687_v7, %v1655_v46  ;;  %v1734_v23 = vsel %vm674_vm2, %v1731_v44, %v1733_v30  ;;  %v1844_v63 = vadd.f32 %v1827_v33, %v1797_v12  ;;  %v1825_v18 = vrot.slane %v1804_v45, 5  ;;  %v2017_v44 = vld [vmem:[%s3687_s6 + $0x30] sm:$0xff]  ;;  %v2022_v46 = vld [vmem:[%s3687_s6 + $0x58] sm:$0xff]  ;;  %v2024_v7 = vld [vmem:[%s3687_s6 + $0x68] sm:$0xff] }
 0x15a   : > { %1927 = vst.msk [vmem:[#allocation2 + $0x18] sm:$0xff] %vm1923_vm6, %v1918_v42  ;;  %v1851_v17 = vmul.f32 %v1595_v31, %v2496_v48  ;;  %v1944_v6 = vmax.f32 %v1933_v50, %v1939_v57  ;;  %v1544_v3 = vadd.f32 %v3282_v8, %v3302_v39  ;;  %v1748_v38 = vadd.f32 %v1732_v34, %v1701_v10  ;;  %v2013_v8 = vld [vmem:[%s3687_s6 + $0x10] sm:$0xff]  ;;  %v2014_v39 = vld [vmem:[%s3687_s6 + $0x18] sm:$0xff]  ;;  %v2019_v42 = vld [vmem:[%s3687_s6 + $0x40] sm:$0xff] }
 0x15b   : > { %v1749_v53 = vadd.f32 %v1734_v23, %v1702_v47  ;;  %v1891_v25 = vadd.f32 %v1874_v59, %v1844_v63  ;;  %v1779_v48 = vsel %vm726_vm3, %v1776_v9, %v1778_v61  ;;  %v1781_v31 = vsel %vm726_vm3, %v1778_v61, %v1780_v62  ;;  %v2023_v57 = vld [vmem:[%s3687_s6 + $0x60] sm:$0xff] }
 0x15c   : > { %v1872_v30 = vrot.slane %v1851_v17, 6  ;;  %v2395_v15 = vmov 0.0|0.0   ;;  %v1795_v52 = vadd.f32 %v1779_v48, %v1748_v38  ;;  %v1953_v36 = vmax.f32 %v1944_v6, %v1948_v24  ;;  %v2027_v38 = vld [vmem:[%s3687_s6 + $0x80] sm:$0xff]  ;;  %v2029_v48 = vld [vmem:[%s3687_s6 + $0x90] sm:$0xff]  ;;  %v2030_v24 = vld [vmem:[%s3687_s6 + $0x98] sm:$0xff] }
 0x15d   : > { %2294 = vmatprep.subr.bf16.mxu0 %v2395_v15  ;;  %v1796_v28 = vadd.f32 %v1781_v31, %v1749_v53  ;;  %v2295_v40 = vpack.c.bf16 %v2012_v14, %v2011_v51  ;;  %v1899_v9 = vmax.f32 %v3271_v37, %v1891_v25  ;;  %v1826_v62 = vsel %vm778_vm4, %v1823_v32, %v1825_v18  ;;  %v2015_v32 = vld [vmem:[%s3687_s6 + $0x20] sm:$0xff]  ;;  %v2025_v51 = vld [vmem:[%s3687_s6 + $0x70] sm:$0xff]  ;;  %v2026_v14 = vld [vmem:[%s3687_s6 + $0x78] sm:$0xff] }
 0x15e   : > { %v1828_v5 = vsel %vm778_vm4, %v1825_v18, %v1827_v33  ;;  %v1842_v29 = vadd.f32 %v1826_v62, %v1795_v52  ;;  %1956 = vst.msk [vmem:[#allocation3] sm:$0xff] %vm1923_vm6, %v1953_v36  ;;  %v2298_v13 = vpack.c.bf16 %v2014_v39, %v2013_v8  ;;  %v3718_v60 = vmax.f32 %v2763_v58, %v3010_v16  ;;  %v2016_v58 = vld [vmem:[%s3687_s6 + $0x28] sm:$0xff] }
 0x15f   : > { %v1843_v35 = vadd.f32 %v1828_v5, %v1796_v28  ;;  %2296 = vmatpush1.bf16.msra.mxu0 %v2295_v40  ;;  %v1914_v55 = vadd.f32 %v3364_v41, %v1899_v9  ;;  %v1873_v37 = vsel %vm830_vm5, %v1870_v27, %v1872_v30  ;;  %v1875_v54 = vsel %vm830_vm5, %v1872_v30, %v1874_v59  ;;  %v2028_v53 = vld [vmem:[%s3687_s6 + $0x88] sm:$0xff] }
 0x160   : > { %v1551_v0 = vmax.f32 %v3718_v60, %v3460_v22  ;;  %2297 = vmatprep.subr.bf16.mxu0 %v2395_v15  ;;  %v3719_v16 = vmax.f32 %v2765_v26, %v3012_v2  ;;  %v1889_v22 = vadd.f32 %v1873_v37, %v1842_v29  ;;  %v2301_v43 = vpack.c.bf16 %v2016_v58, %v2015_v32  ;;  %v2018_v26 = vld [vmem:[%s3687_s6 + $0x38] sm:$0xff]  ;;  %v2032_v60 = vld [vmem:[%s3687_s6 + $0xa8] sm:$0xff]  ;;  %v2033_v32 = vld [vmem:[%s3687_s6 + $0xb0] sm:$0xff] }
 0x161   : > { %v1890_v27 = vadd.f32 %v1875_v54, %v1843_v35  ;;  %v1922_v19 = vmax.f32 %v1914_v55, 0.0  ;;  %v2304_v45 = vpack.c.bf16 %v2018_v26, %v2017_v44  ;;  %v2310_v50 = vpack.c.bf16 %v2022_v46, %v2021_v21  ;;  %v2034_v58 = vld [vmem:[%s3687_s6 + $0xb8] sm:$0xff] }
 0x162   : > { %v1552_v11 = vmax.f32 %v3719_v16, %v1544_v3  ;;  %v1897_v33 = vmax.f32 %v1551_v0, %v1889_v22  ;;  %v2313_v17 = vpack.c.bf16 %v2024_v7, %v2023_v57  ;;  %v2316_v3 = vpack.c.bf16 %v2026_v14, %v2025_v51  ;;  %v2036_v22 = vld [vmem:[%s3687_s6 + $0xc8] sm:$0xff] }
 0x163   : > { %2299 = vmatpush1.bf16.msra.mxu0 %v2298_v13  ;;  %1932 = vst.msk [vmem:[#allocation2 + $0x38] sm:$0x3] %vm1931_vm7, %v1922_v19  ;;  %v2319_v25 = vpack.c.bf16 %v2028_v53, %v2027_v38  ;;  %v2322_v62 = vpack.c.bf16 %v2030_v24, %v2029_v48  ;;  %v2031_v13 = vld [vmem:[%s3687_s6 + $0xa0] sm:$0xff]  ;;  %v2328_v16 = vpack.c.bf16 %v2034_v58, %v2033_v32  ;;  %v2037_v19 = vld [vmem:[%s3687_s6 + $0xd0] sm:$0xff] }
 0x164   : > { %v1898_v59 = vmax.f32 %v1552_v11, %v1890_v27  ;;  %2300 = vmatprep.subr.bf16.mxu0 %v2395_v15  ;;  %v1912_v2 = vadd.f32 %v3364_v41, %v1897_v33  ;;  %v2325_v37 = vpack.c.bf16 %v2032_v60, %v2031_v13  ;;  %v2035_v11 = vld [vmem:[%s3687_s6 + $0xc0] sm:$0xff]  ;;  %v2038_v33 = vld [vmem:[%s3687_s6 + $0xd8] sm:$0xff] }
 0x165   : > { %v2331_v27 = vpack.c.bf16 %v2036_v22, %v2035_v11 }
 0x166   : > { %v1913_v20 = vadd.f32 %v3364_v41, %v1898_v59  ;;  %v1920_v1 = vmax.f32 %v1912_v2, 0.0  ;;  %v2307_v41 = vpack.c.bf16 %v2020_v4, %v2019_v42  ;;  %v2334_v59 = vpack.c.bf16 %v2038_v33, %v2037_v19 }
 0x167   : > { %2302 = vmatpush1.bf16.msra.mxu0 %v2301_v43 }
 0x168   : > { %v1921_v56 = vmax.f32 %v1913_v20, 0.0  ;;  %2303 = vmatprep.subr.bf16.mxu0 %v2395_v15  ;;  %1929 = vst.msk [vmem:[#allocation2 + $0x28] sm:$0xff] %vm1923_vm6, %v1920_v1 }
 0x16a   : > { %1930 = vst.msk [vmem:[#allocation2 + $0x30] sm:$0xff] %vm1923_vm6, %v1921_v56 }
 0x16b   : > { %2305 = vmatpush1.bf16.msra.mxu0 %v2304_v45 }
 0x16c   : > { %2306 = vmatprep.subr.bf16.mxu0 %v2395_v15 }
 0x16f   : > { %2308 = vmatpush1.bf16.msra.mxu0 %v2307_v41  ;;  %v1935_v12 = vld [vmem:[#allocation2 + $0x18] ss:$3 sm:$0xff]  ;;  %v1941_v49 = vld [vmem:[#allocation2 + $0x19] ss:$3 sm:$0xff]  ;;  %v1950_v34 = vld [vmem:[#allocation2 + $0x1a] ss:$3 sm:$0xff] }
 0x170   : > { %2309 = vmatprep.subr.bf16.mxu0 %v2395_v15  ;;  %v1945_v61 = vmax.f32 %v1935_v12, %v1941_v49 }
 0x171   : > { %v1937_v10 = vld [vmem:[#allocation2 + $0x30] ss:$3 sm:$0x7]  ;;  %v1943_v47 = vld [vmem:[#allocation2 + $0x31] ss:$3 sm:$0x7] }
 0x172   : > { %v1946_v23 = vmax.f32 %v1937_v10, %v1943_v47  ;;  %v1954_v63 = vmax.f32 %v1945_v61, %v1950_v34  ;;  %v1952_v18 = vld [vmem:[#allocation2 + $0x32] ss:$3 sm:$0x7] }
 0x173   : > { %2311 = vmatpush1.bf16.msra.mxu0 %v2310_v50 }
 0x174   : > { %v1955_v6 = vmax.f32 %v1946_v23, %v1952_v18  ;;  %2312 = vmatprep.subr.bf16.mxu0 %v2395_v15  ;;  %1957 = vst.msk [vmem:[#allocation3 + $0x8] sm:$0xff] %vm1923_vm6, %v1954_v63 }
 0x176   : > { %1959 = vst.msk [vmem:[#allocation3 + $0x10] sm:$0x7] %vm1958_vm8, %v1955_v6 }
 0x177   : > { %2314 = vmatpush1.bf16.msra.mxu0 %v2313_v17 }
 0x178   : > { %2315 = vmatprep.subr.bf16.mxu0 %v2395_v15 }
 0x17b   : > { %2317 = vmatpush1.bf16.msra.mxu0 %v2316_v3  ;;  %v1964_v31 = vld [vmem:[#allocation3 + $0x1] ss:$2 sm:$0xff]  ;;  %v1960_v30 = vld [vmem:[#allocation3] ss:$2 sm:$0xff] }
 0x17c   : > { %2318 = vmatprep.subr.bf16.mxu0 %v2395_v15  ;;  %1970 = vrot.lane.b32.xlu0 %v1964_v31, %s2396_s15  ;;  %v1995_v8 = vrot.slane %v1964_v31, 2  ;;  %1968 = vst.msk [vmem:[#allocation4] sm:$0x7f] %vm1967_vm9, %v1960_v30  ;;  %v1989_v36 = vrot.slane %v1960_v30, 2  ;;  %v1976_v40 = vrot.slane %v1960_v30, 1  ;;  %v2002_v29 = vrot.slane %v1960_v30, 3 }
 0x17d   : > { %v1966_v39 = vld [vmem:[#allocation3 + $0x11] ss:$2 sm:$0x1]  ;;  %v1962_v28 = vld [vmem:[#allocation3 + $0x10] ss:$2 sm:$0x3] }
 0x17e   : > { %v1996_v52 = vrot.slane %v1966_v39, 2  ;;  %v1990_v9 = vrot.slane %v1962_v28, 2  ;;  %v2003_v35 = vrot.slane %v1962_v28, 3  ;;  %v1982_v55 = vrot.slane %v1964_v31, 1 }
 0x17f   : > { %2320 = vmatpush1.bf16.msra.mxu0 %v2319_v25 }
 0x180   : > { %v1997_v5 = vsel %vm622_vm1, %v1995_v8, %v1996_v52  ;;  %2321 = vmatprep.subr.bf16.mxu0 %v2395_v15  ;;  %1977 = vrot.lane.b32.xlu0 %v1976_v40, %s2397_s20  ;;  %v1991_v0 = vsel %vm622_vm1, %v1989_v36, %v1990_v9  ;;  %v2004_v54 = vsel %vm674_vm2, %v2002_v29, %v2003_v35 }
 0x181   : > { %1998 = vrot.lane.b32.xlu1 %v1997_v5, %s2396_s15  ;;  %1993 = vst.msk [vmem:[#allocation4 + $0x8] sm:$0x7f] %vm1967_vm9, %v1991_v0 }
 0x183   : > { %2323 = vmatpush1.bf16.msra.mxu0 %v2322_v62 }
 0x184   : > { %2324 = vmatprep.subr.bf16.mxu0 %v2395_v15  ;;  %1983 = vrot.lane.b32.xlu0 %v1982_v55, %s2398_s25 }
 0x185   : > { %2005 = vrot.lane.b32.xlu1 %v2004_v54, %s2397_s20 }
 0x187   : > { %2326 = vmatpush1.bf16.msra.mxu0 %v2325_v37 }
 0x188   : > { %2327 = vmatprep.subr.bf16.mxu0 %v2395_v15 }
 0x18b   : > { %2329 = vmatpush1.bf16.msra.mxu0 %v2328_v16 }
 0x18c   : > { %2330 = vmatprep.subr.bf16.mxu0 %v2395_v15 }
 0x18f   : > { %2332 = vmatpush1.bf16.msra.mxu0 %v2331_v27 }
 0x190   : > { %2333 = vmatprep.subr.bf16.mxu0 %v2395_v15  ;;  %v2284_v15 = vld [vmem:[%s3688_s7] ss:$0 sm:$0xff] }
 0x193   : > { %2335 = vmatpush1.bf16.msra.mxu0 %v2334_v59 }
 0x1ee   : > { %v1971_v43 = vpop.permute.xlu0 %1970 }
 0x1ef   : > { %1974 = vst.msk [vmem:[#allocation4] sm:$0x7f] %vm1973_vm10, %v1971_v43 }
 0x1f2   : > { %v1978_v26 = vpop.permute.xlu0 %1977 }
 0x1f3   : > { %v1999_v44 = vpop.permute.xlu1 %1998  ;;  %1981 = vst.msk [vmem:[#allocation4] sm:$0x7f] %vm1980_vm11, %v1978_v26 }
 0x1f4   : > { %2001 = vst.msk [vmem:[#allocation4 + $0x8] sm:$0x7f] %vm1973_vm10, %v1999_v44 }
 0x1f6   : > { %v1984_v20 = vpop.permute.xlu0 %1983 }
 0x1f7   : > { %v2006_v2 = vpop.permute.xlu1 %2005  ;;  %1987 = vst.msk [vmem:[#allocation4] sm:$0x7f] %vm1986_vm12, %v1984_v20 }
 0x1f8   : > { %2008 = vst.msk [vmem:[#allocation4 + $0x8] sm:$0x7f] %vm1980_vm11, %v2006_v2 }
 0x1fe   : > { %v2009_v56 = vld [vmem:[#allocation4] sm:$0x7f] }
 0x1ff   : > { %v2010_v1 = vld [vmem:[#allocation4 + $0x8] sm:$0x7f] }
 0x200   : > { %2285 = vmatprep.mubr.msk.f32.mxu0 %vm2046_vm13, %v2010_v1 }
 0x201   : > { %2115 = vmatmul.mubr.f32.vlgmr.msra.gmra.mrb[0].mxu0 %v2009_v56 }
 0x2d4   : > { %v2116_v45 = vpop.f32.mrb[0].mxu0 }
 0x2d5   : > { %v2117_v42 = vadd.f32 %v2284_v15, %v2116_v45  ;;  %v2118_v4 = vpop.f32.mrb[1].mxu0 }
 0x2d7   : > { %v2120_v41 = vmax.f32 %v2117_v42, 0.0 }
 0x2d9   : > { %2121 = vst.msk [vmem:[#allocation5] sm:$0x7f] %vm1967_vm9, %v2120_v41 }
 0x2e0   : > { %v2122_v21 = vld [vmem:[#allocation5] ss:$3 sm:$0x3]  ;;  %v2124_v46 = vld [vmem:[#allocation5 + $0x1] ss:$3 sm:$0x3] }
 0x2e1   : > { %v2125_v50 = vmax.f32 %v2122_v21, %v2124_v46  ;;  %v2127_v57 = vld [vmem:[#allocation5 + $0x2] ss:$3 sm:$0x3] }
 0x2e3   : > { %v2128_v12 = vmax.f32 %v2125_v50, %v2127_v57 }
 0x2e5   : > { %2129 = vst.msk [vmem:[%s488_s21] sm:$0x3] %vm1931_vm7, %v2128_v12 }
 0x2e6 PF: > { %s18_s29 = sadd.s32 1, %s2392_s29   ;;  %s3720_s27 = smov %s2388_s28 }
 0x2e7   : > { %p15_p5 = scmp.ge.s32.totalorder %s18_s29, 4   ;;  %s3721_s28 = smov %s3723_s30 }
 0x2e9   :  { %17 = sbr.rel (!%p15_p5) target bundleno = 2 (0x2), region = 104 }

</bundles_post_ra>
